<compile_context>
chip_gen: v5e
topology: v5e:2x2
jax: 0.10.0
libtpu: 0.0.40
codegen_flags: <defaults>
</compile_context>

<pallas_src>
import functools

import numpy as np
import jax
import jax.numpy as jnp
from jax.experimental import pallas as pl
from jax.experimental.pallas import tpu as pltpu

_NB = 8  # batch elements fused per grid step (stacked along sublanes)


# ----------------------------------------------------------------------------
# Fused forward kernel: one grid step == _NB batch elements
# ----------------------------------------------------------------------------
def _fused_forward_kernel(x1_ref, w1_ref, b1_ref, s1e_ref, s1o_ref,
                          sup_ref, sdn_ref, w2_ref, b2_ref, s2e_ref, s2o_ref,
                          pf_ref, fc1w_ref, fc1b_ref, fc2w_ref, fc2b_ref,
                          logits_ref, emb_ref):
    dot = functools.partial(jnp.dot, preferred_element_type=jnp.float32)
    nb = emb_ref.shape[1]                       # elements stacked in this step

    # ---- conv1 (3x3, pad=1): one K-stacked MXU matmul on (NB*H, 3*W*Cin) ----
    c1 = jnp.maximum(dot(x1_ref[...], w1_ref[...]) + b1_ref[...], 0.0)

    # ---- maxpool 2x2 (stage 1) ----------------------------------------------
    # horizontal pairs sit exactly 128 lanes apart (columns permuted at init)
    # -> pure VPU max of two aligned lane halves; vertical pairs via two tiny
    # exact 0/1 row-selection matmuls.
    half = c1.shape[1] // 2
    h1 = jnp.maximum(c1[:, :half], c1[:, half:])                 # (NB*H, 128)
    p1 = jnp.maximum(dot(s1e_ref[...], h1), dot(s1o_ref[...], h1))  # (NB*H2, 128)

    # ---- conv2 (3x3, pad=1): K-stack [row-1 | row | row+1] along lanes ------
    # (the shift matrices emit exact zero halo rows at element boundaries)
    x2 = jnp.concatenate(
        [dot(sup_ref[...], p1), p1, dot(sdn_ref[...], p1)], axis=-1)  # (NB*H2, 384)
    c2 = jnp.maximum(dot(x2, w2_ref[...]) + b2_ref[...], 0.0)         # (NB*H2, 256)

    # ---- maxpool 2x2 (stage 2); row selectors emit h-major order ------------
    half = c2.shape[1] // 2
    h2 = jnp.maximum(c2[:, :half], c2[:, half:])                      # (NB*H2, 128)
    p2 = jnp.maximum(dot(s2e_ref[...], h2), dot(s2o_ref[...], h2))    # (H4*NB, 128)

    # ---- flatten to torch NCHW order: one permutation matmul ----------------
    h4 = p2.shape[0] // nb
    xf = jnp.concatenate([p2[h * nb:(h + 1) * nb, :] for h in range(h4)],
                         axis=-1)                                     # (NB, H4*128)
    emb = dot(xf, pf_ref[...])                                        # (NB, F)
    emb_ref[0] = emb

    # ---- classifier MLP (fc2 padded to 128 lanes -> unmasked store) ---------
    hid = jnp.maximum(dot(emb, fc1w_ref[...]) + fc1b_ref[...], 0.0)   # (NB, 128)
    logits_ref[0] = dot(hid, fc2w_ref[...]) + fc2b_ref[...]           # (NB, 128)


# ----------------------------------------------------------------------------
# Init-time matrix builders (host-side precompute — free per forward)
# ----------------------------------------------------------------------------
def _conv_band(w_oihw, Wd, lane_of):
    """Torch conv weight (Cout,Cin,3,3) -> K-stacked band matrix
    (3*Wd*Cin, Wd*Cout).  Input lanes: dy*(Wd*Cin) + wi*Cin + ci hold the
    value of input row (h+dy-1), column wi, channel ci.  Output lane of
    (wo, co) is given by lane_of (used to permute columns for pooling)."""
    w = np.asarray(w_oihw, np.float32)
    Cout, Cin = w.shape[0], w.shape[1]
    M = np.zeros((3 * Wd * Cin, Wd * Cout), np.float32)
    for dy in range(3):
        for wo in range(Wd):
            for dx in range(3):
                wi = wo + dx - 1
                if 0 <= wi < Wd:
                    for ci in range(Cin):
                        for co in range(Cout):
                            M[dy * Wd * Cin + wi * Cin + ci,
                              lane_of(wo, co)] = w[co, ci, dy, dx]
    return jnp.asarray(M)


def _pool_row_selectors(nb, h_in, out_h_major):
    """Exact 0/1 even/odd row selectors for 2x vertical max-pool on a
    batch-stacked slab (nb elements x h_in rows).  Output rows are batch-major
    (n*h_out + r) or h-major (r*nb + n) depending on out_h_major."""
    h_out = h_in // 2
    S = np.zeros((2, nb * h_out, nb * h_in), np.float32)
    for n in range(nb):
        for r in range(h_out):
            o = (r * nb + n) if out_h_major else (n * h_out + r)
            S[0, o, n * h_in + 2 * r] = 1.0
            S[1, o, n * h_in + 2 * r + 1] = 1.0
    return jnp.asarray(S[0]), jnp.asarray(S[1])


def _halo_row_shifters(nb, h):
    """0/1 matrices shifting each element's rows by -1 / +1 with zero rows at
    the element boundaries (== the zero H-padding the next conv needs)."""
    U = np.zeros((nb * h, nb * h), np.float32)
    D = np.zeros((nb * h, nb * h), np.float32)
    for n in range(nb):
        for r in range(h):
            if r >= 1:
                U[n * h + r, n * h + r - 1] = 1.0
            if r + 1 < h:
                D[n * h + r, n * h + r + 1] = 1.0
    return jnp.asarray(U), jnp.asarray(D)


def _flatten_mat(h4, w4, c):
    """(h4 * w4*c, F) permutation: lane-concatenated pooled row blocks
    X_flat[n, h*(w4*c) + w*c + ch] -> torch NCHW flatten order."""
    L = w4 * c
    F = c * h4 * w4
    P = np.zeros((h4 * L, F), np.float32)
    for h in range(h4):
        for w in range(w4):
            for ch in range(c):
                P[h * L + w * c + ch, ch * h4 * w4 + h * w4 + w] = 1.0
    return jnp.asarray(P)


def init_params(key, num_classes, H, W):
    C1, C2 = 16, 32
    H2, W2, H4, W4 = H // 2, W // 2, H // 4, W // 4
    flattened_size = C2 * H4 * W4
    nc_pad = ((num_classes + 127) // 128) * 128          # lane-dense logits

    ks = jax.random.split(key, 8)
    torch_p = {
        "conv1_w": jax.random.normal(ks[0], (C1, 1, 3, 3), jnp.float32) * 0.10,
        "conv1_b": jax.random.normal(ks[1], (C1,), jnp.float32) * 0.10,
        "conv2_w": jax.random.normal(ks[2], (C2, C1, 3, 3), jnp.float32) * 0.05,
        "conv2_b": jax.random.normal(ks[3], (C2,), jnp.float32) * 0.05,
        "fc1_w": jax.random.normal(ks[4], (128, flattened_size), jnp.float32) * 0.02,
        "fc1_b": jax.random.normal(ks[5], (128,), jnp.float32) * 0.02,
        "fc2_w": jax.random.normal(ks[6], (num_classes, 128), jnp.float32) * 0.02,
        "fc2_b": jax.random.normal(ks[7], (num_classes,), jnp.float32) * 0.02,
    }

    # Column layouts that place the two columns of every horizontal 2x-pool
    # pair exactly (W/2)*C lanes (= 128) apart.
    lane1 = lambda w, c: (w % 2) * (W // 2) * C1 + (w // 2) * C1 + c
    lane2 = lambda w, c: (w % 2) * (W2 // 2) * C2 + (w // 2) * C2 + c

    s1e, s1o = _pool_row_selectors(_NB, H, out_h_major=False)
    s2e, s2o = _pool_row_selectors(_NB, H2, out_h_major=True)
    sup, sdn = _halo_row_shifters(_NB, H2)

    fc2wp = np.zeros((128, nc_pad), np.float32)
    fc2wp[:, :num_classes] = np.asarray(torch_p["fc2_w"]).T
    fc2bp = np.zeros((1, nc_pad), np.float32)
    fc2bp[0, :num_classes] = np.asarray(torch_p["fc2_b"])

    kernel_p = {
        "w1b": _conv_band(torch_p["conv1_w"], W, lane1),          # (48, 256)
        "b1r": jnp.asarray(np.tile(np.asarray(torch_p["conv1_b"]), W))[None, :],
        "s1e": s1e, "s1o": s1o,                                   # (128, 256) x2? no: (NB*H2, NB*H)
        "sup": sup, "sdn": sdn,                                   # (NB*H2, NB*H2)
        "w2b": _conv_band(torch_p["conv2_w"], W2, lane2),         # (384, 256)
        "b2r": jnp.asarray(np.tile(np.asarray(torch_p["conv2_b"]), W2))[None, :],
        "s2e": s2e, "s2o": s2o,                                   # (H4*NB, NB*H2)
        "pflat": _flatten_mat(H4, W4, C2),                        # (512, 512)
        "fc1_w": torch_p["fc1_w"].T,                              # (F, 128)
        "fc1_b": torch_p["fc1_b"].reshape(1, -1),
        "fc2_w": jnp.asarray(fc2wp),                              # (128, nc_pad)
        "fc2_b": jnp.asarray(fc2bp),
    }
    return kernel_p, torch_p


# ----------------------------------------------------------------------------
# Forward wrapper
# ----------------------------------------------------------------------------
def _min_grid_steps():
    # v7x has 2 TensorCores per chip (v4/v5p have megacore): give the
    # "parallel" grid axis at least 2 steps there so both cores get work.
    # On single-core v5e/v6e keep the minimum number of (larger) steps.
    try:
        kind = jax.devices()[0].device_kind.lower()
    except Exception:
        return 1
    return 2 if any(t in kind for t in ("v7", "7x", "v4", "v5p")) else 1


def simple_stt_forward(x_nchw, kp, num_classes):
    N, Cin, H, W = x_nchw.shape
    F = kp["pflat"].shape[1]
    nc_pad = kp["fc2_w"].shape[1]
    NB = _NB

    steps = max(pl.cdiv(N, NB), _min_grid_steps())
    n_pad = steps * NB

    x = x_nchw.astype(jnp.float32)
    if n_pad != N:
        x = jnp.pad(x, ((0, n_pad - N), (0, 0), (0, 0), (0, 0)))

    # NHWC row slabs (n_pad, H, W*Cin); K-stacked conv1 LHS with the H-halo
    # folded into the same construction (no separate padded copy of x).
    xs = jnp.transpose(x, (0, 2, 3, 1)).reshape(n_pad, H, W * Cin)
    up = jnp.pad(xs, ((0, 0), (1, 0), (0, 0)))[:, :H, :]   # row h-1 (0 at top)
    dn = jnp.pad(xs, ((0, 0), (0, 1), (0, 0)))[:, 1:, :]   # row h+1 (0 at bottom)
    x1 = jnp.concatenate([up, xs, dn], axis=-1).reshape(n_pad * H, 3 * W * Cin)

    weights = [kp[k] for k in ("w1b", "b1r", "s1e", "s1o", "sup", "sdn",
                               "w2b", "b2r", "s2e", "s2o", "pflat",
                               "fc1_w", "fc1_b", "fc2_w", "fc2_b")]

    def bcast_spec(arr):                       # grid-invariant weight operand
        nd = arr.ndim
        return pl.BlockSpec(arr.shape, lambda i, _nd=nd: (0,) * _nd)

    in_specs = [pl.BlockSpec((NB * H, 3 * W * Cin), lambda i: (i, 0))]
    in_specs += [bcast_spec(w) for w in weights]

    out_specs = (
        pl.BlockSpec((1, NB, nc_pad), lambda i: (i, 0, 0)),
        pl.BlockSpec((1, NB, F), lambda i: (i, 0, 0)),
    )
    out_shape = (
        jax.ShapeDtypeStruct((steps, NB, nc_pad), jnp.float32),
        jax.ShapeDtypeStruct((steps, NB, F), jnp.float32),
    )

    logits_p, emb_p = pl.pallas_call(
        _fused_forward_kernel,
        grid=(steps,),
        in_specs=in_specs,
        out_specs=out_specs,
        out_shape=out_shape,
        compiler_params=pltpu.CompilerParams(
            dimension_semantics=("parallel",)),
    )(x1, *weights)

    logits = logits_p.reshape(steps * NB, nc_pad)[:N, :num_classes]
    emb = emb_p.reshape(steps * NB, F)[:N]
    return logits, emb


# ----------------------------------------------------------------------------
# Pure-JAX reference of the PyTorch forward (correctness check only)
# ----------------------------------------------------------------------------
def reference_forward(x_nchw, tp):
    x = jnp.transpose(x_nchw, (0, 2, 3, 1)).astype(jnp.float32)

    def conv(x, w, b):
        wk = jnp.transpose(w, (2, 3, 1, 0))   # HWIO
        y = jax.lax.conv_general_dilated(
            x, wk, (1, 1), "SAME", dimension_numbers=("NHWC", "HWIO", "NHWC"))
        return jnp.maximum(y + b, 0.0)

    def pool(x):
        return jax.lax.reduce_window(
            x, -jnp.inf, jax.lax.max, (1, 2, 2, 1), (1, 2, 2, 1), "VALID")

    y = pool(conv(x, tp["conv1_w"], tp["conv1_b"]))
    y = pool(conv(y, tp["conv2_w"], tp["conv2_b"]))
    emb = jnp.transpose(y, (0, 3, 1, 2)).reshape(x.shape[0], -1)
    h = jnp.maximum(emb @ tp["fc1_w"].T + tp["fc1_b"], 0.0)
    logits = h @ tp["fc2_w"].T + tp["fc2_b"]
    return logits, emb


if __name__ == "__main__":
    key = jax.random.PRNGKey(0)
    k_x, k_p = jax.random.split(key)

    N, H, W = 8, 16, 16
    num_classes = 10
    flattened_size = 32 * (H // 4) * (W // 4)     # 512

    x = jax.random.normal(k_x, (N, 1, H, W), jnp.float32)
    kernel_params, torch_params = init_params(k_p, num_classes, H, W)

    fwd = jax.jit(simple_stt_forward, static_argnames=("num_classes",))
    logits, emb = fwd(x, kernel_params, num_classes=num_classes)
    jax.block_until_ready((logits, emb))

    ref_logits, ref_emb = reference_forward(x, torch_params)
    assert logits.shape == (N, num_classes) and emb.shape == (N, flattened_size)
    assert jnp.allclose(emb, ref_emb, atol=1e-4, rtol=1e-4)
    assert jnp.allclose(logits, ref_logits, atol=1e-4, rtol=1e-4)

    print("KERNEL_OK")
</pallas_src>

<mosaic_0001>
module attributes {stable_mosaic.version = 11 : i64} {
  func.func @_fused_forward_kernel(%arg0: i32, %arg1: memref<128x48xf32, #tpu.memory_space<vmem>>, %arg2: memref<48x256xf32, #tpu.memory_space<vmem>>, %arg3: memref<1x256xf32, #tpu.memory_space<vmem>>, %arg4: memref<64x128xf32, #tpu.memory_space<vmem>>, %arg5: memref<64x128xf32, #tpu.memory_space<vmem>>, %arg6: memref<64x64xf32, #tpu.memory_space<vmem>>, %arg7: memref<64x64xf32, #tpu.memory_space<vmem>>, %arg8: memref<384x256xf32, #tpu.memory_space<vmem>>, %arg9: memref<1x256xf32, #tpu.memory_space<vmem>>, %arg10: memref<32x64xf32, #tpu.memory_space<vmem>>, %arg11: memref<32x64xf32, #tpu.memory_space<vmem>>, %arg12: memref<512x512xf32, #tpu.memory_space<vmem>>, %arg13: memref<512x128xf32, #tpu.memory_space<vmem>>, %arg14: memref<1x128xf32, #tpu.memory_space<vmem>>, %arg15: memref<128x128xf32, #tpu.memory_space<vmem>>, %arg16: memref<1x128xf32, #tpu.memory_space<vmem>>, %arg17: memref<1x8x128xf32, #tpu.memory_space<vmem>>, %arg18: memref<1x8x512xf32, #tpu.memory_space<vmem>>) attributes {dimension_semantics = [#tpu.dimension_semantics<parallel>], iteration_bounds = array<i64: 1>, scalar_prefetch = 0 : i64, scratch_operands = 0 : i64, tpu.core_type = #tpu.core_type<tc>, window_params = [{transform_indices = @transform_0, window_bounds = array<i64: 128, 48>}, {pipeline_mode = #tpu.pipeline_mode<synchronous>, transform_indices = @transform_1, window_bounds = array<i64: 48, 256>}, {pipeline_mode = #tpu.pipeline_mode<synchronous>, transform_indices = @transform_2, window_bounds = array<i64: 1, 256>}, {pipeline_mode = #tpu.pipeline_mode<synchronous>, transform_indices = @transform_3, window_bounds = array<i64: 64, 128>}, {pipeline_mode = #tpu.pipeline_mode<synchronous>, transform_indices = @transform_4, window_bounds = array<i64: 64, 128>}, {pipeline_mode = #tpu.pipeline_mode<synchronous>, transform_indices = @transform_5, window_bounds = array<i64: 64, 64>}, {pipeline_mode = #tpu.pipeline_mode<synchronous>, transform_indices = @transform_6, window_bounds = array<i64: 64, 64>}, {pipeline_mode = #tpu.pipeline_mode<synchronous>, transform_indices = @transform_7, window_bounds = array<i64: 384, 256>}, {pipeline_mode = #tpu.pipeline_mode<synchronous>, transform_indices = @transform_8, window_bounds = array<i64: 1, 256>}, {pipeline_mode = #tpu.pipeline_mode<synchronous>, transform_indices = @transform_9, window_bounds = array<i64: 32, 64>}, {pipeline_mode = #tpu.pipeline_mode<synchronous>, transform_indices = @transform_10, window_bounds = array<i64: 32, 64>}, {pipeline_mode = #tpu.pipeline_mode<synchronous>, transform_indices = @transform_11, window_bounds = array<i64: 512, 512>}, {pipeline_mode = #tpu.pipeline_mode<synchronous>, transform_indices = @transform_12, window_bounds = array<i64: 512, 128>}, {pipeline_mode = #tpu.pipeline_mode<synchronous>, transform_indices = @transform_13, window_bounds = array<i64: 1, 128>}, {pipeline_mode = #tpu.pipeline_mode<synchronous>, transform_indices = @transform_14, window_bounds = array<i64: 128, 128>}, {pipeline_mode = #tpu.pipeline_mode<synchronous>, transform_indices = @transform_15, window_bounds = array<i64: 1, 128>}, {transform_indices = @transform_16, window_bounds = array<i64: 1, 8, 128>}, {transform_indices = @transform_17, window_bounds = array<i64: 1, 8, 512>}]} {
    %c0 = arith.constant 0 : index
    %c0_0 = arith.constant 0 : index
    %0 = vector.load %arg1[%c0, %c0_0] : memref<128x48xf32, #tpu.memory_space<vmem>>, vector<128x48xf32>
    %c0_1 = arith.constant 0 : index
    %c0_2 = arith.constant 0 : index
    %1 = vector.load %arg2[%c0_1, %c0_2] : memref<48x256xf32, #tpu.memory_space<vmem>>, vector<48x256xf32>
    %cst = arith.constant dense<0.000000e+00> : vector<128x256xf32>
    %2 = tpu.matmul %0, %1, %cst {dimension_numbers = #tpu.dot_dimension_numbers<[1], [0], [0], [1], [0, 0, 1, 1], [], []>} : vector<128x48xf32>, vector<48x256xf32>, vector<128x256xf32> -> vector<128x256xf32>
    %c0_3 = arith.constant 0 : index
    %c0_4 = arith.constant 0 : index
    %3 = vector.load %arg3[%c0_3, %c0_4] : memref<1x256xf32, #tpu.memory_space<vmem>>, vector<1x256xf32>
    %4 = vector.broadcast %3 : vector<1x256xf32> to vector<128x256xf32>
    %5 = arith.addf %2, %4 : vector<128x256xf32>
    %cst_5 = arith.constant 0.000000e+00 : f32
    %6 = vector.broadcast %cst_5 : f32 to vector<128x256xf32>
    %7 = arith.maximumf %5, %6 : vector<128x256xf32>
    %8 = vector.extract_strided_slice %7 {offsets = [0, 0], sizes = [128, 128], strides = [1, 1]} : vector<128x256xf32> to vector<128x128xf32>
    %9 = vector.extract_strided_slice %7 {offsets = [0, 128], sizes = [128, 128], strides = [1, 1]} : vector<128x256xf32> to vector<128x128xf32>
    %10 = arith.maximumf %8, %9 : vector<128x128xf32>
    %c0_6 = arith.constant 0 : index
    %c0_7 = arith.constant 0 : index
    %11 = vector.load %arg4[%c0_6, %c0_7] : memref<64x128xf32, #tpu.memory_space<vmem>>, vector<64x128xf32>
    %cst_8 = arith.constant dense<0.000000e+00> : vector<64x128xf32>
    %12 = tpu.matmul %11, %10, %cst_8 {dimension_numbers = #tpu.dot_dimension_numbers<[1], [0], [0], [1], [0, 0, 1, 1], [], []>} : vector<64x128xf32>, vector<128x128xf32>, vector<64x128xf32> -> vector<64x128xf32>
    %c0_9 = arith.constant 0 : index
    %c0_10 = arith.constant 0 : index
    %13 = vector.load %arg5[%c0_9, %c0_10] : memref<64x128xf32, #tpu.memory_space<vmem>>, vector<64x128xf32>
    %cst_11 = arith.constant dense<0.000000e+00> : vector<64x128xf32>
    %14 = tpu.matmul %13, %10, %cst_11 {dimension_numbers = #tpu.dot_dimension_numbers<[1], [0], [0], [1], [0, 0, 1, 1], [], []>} : vector<64x128xf32>, vector<128x128xf32>, vector<64x128xf32> -> vector<64x128xf32>
    %15 = arith.maximumf %12, %14 : vector<64x128xf32>
    %c0_12 = arith.constant 0 : index
    %c0_13 = arith.constant 0 : index
    %16 = vector.load %arg6[%c0_12, %c0_13] : memref<64x64xf32, #tpu.memory_space<vmem>>, vector<64x64xf32>
    %cst_14 = arith.constant dense<0.000000e+00> : vector<64x128xf32>
    %17 = tpu.matmul %16, %15, %cst_14 {dimension_numbers = #tpu.dot_dimension_numbers<[1], [0], [0], [1], [0, 0, 1, 1], [], []>} : vector<64x64xf32>, vector<64x128xf32>, vector<64x128xf32> -> vector<64x128xf32>
    %c0_15 = arith.constant 0 : index
    %c0_16 = arith.constant 0 : index
    %18 = vector.load %arg7[%c0_15, %c0_16] : memref<64x64xf32, #tpu.memory_space<vmem>>, vector<64x64xf32>
    %cst_17 = arith.constant dense<0.000000e+00> : vector<64x128xf32>
    %19 = tpu.matmul %18, %15, %cst_17 {dimension_numbers = #tpu.dot_dimension_numbers<[1], [0], [0], [1], [0, 0, 1, 1], [], []>} : vector<64x64xf32>, vector<64x128xf32>, vector<64x128xf32> -> vector<64x128xf32>
    %20 = tpu.concatenate %17, %15, %19 in 1 : vector<64x128xf32>, vector<64x128xf32>, vector<64x128xf32> -> vector<64x384xf32>
    %c0_18 = arith.constant 0 : index
    %c0_19 = arith.constant 0 : index
    %21 = vector.load %arg8[%c0_18, %c0_19] : memref<384x256xf32, #tpu.memory_space<vmem>>, vector<384x256xf32>
    %cst_20 = arith.constant dense<0.000000e+00> : vector<64x256xf32>
    %22 = tpu.matmul %20, %21, %cst_20 {dimension_numbers = #tpu.dot_dimension_numbers<[1], [0], [0], [1], [0, 0, 1, 1], [], []>} : vector<64x384xf32>, vector<384x256xf32>, vector<64x256xf32> -> vector<64x256xf32>
    %c0_21 = arith.constant 0 : index
    %c0_22 = arith.constant 0 : index
    %23 = vector.load %arg9[%c0_21, %c0_22] : memref<1x256xf32, #tpu.memory_space<vmem>>, vector<1x256xf32>
    %24 = vector.broadcast %23 : vector<1x256xf32> to vector<64x256xf32>
    %25 = arith.addf %22, %24 : vector<64x256xf32>
    %cst_23 = arith.constant 0.000000e+00 : f32
    %26 = vector.broadcast %cst_23 : f32 to vector<64x256xf32>
    %27 = arith.maximumf %25, %26 : vector<64x256xf32>
    %28 = vector.extract_strided_slice %27 {offsets = [0, 0], sizes = [64, 128], strides = [1, 1]} : vector<64x256xf32> to vector<64x128xf32>
    %29 = vector.extract_strided_slice %27 {offsets = [0, 128], sizes = [64, 128], strides = [1, 1]} : vector<64x256xf32> to vector<64x128xf32>
    %30 = arith.maximumf %28, %29 : vector<64x128xf32>
    %c0_24 = arith.constant 0 : index
    %c0_25 = arith.constant 0 : index
    %31 = vector.load %arg10[%c0_24, %c0_25] : memref<32x64xf32, #tpu.memory_space<vmem>>, vector<32x64xf32>
    %cst_26 = arith.constant dense<0.000000e+00> : vector<32x128xf32>
    %32 = tpu.matmul %31, %30, %cst_26 {dimension_numbers = #tpu.dot_dimension_numbers<[1], [0], [0], [1], [0, 0, 1, 1], [], []>} : vector<32x64xf32>, vector<64x128xf32>, vector<32x128xf32> -> vector<32x128xf32>
    %c0_27 = arith.constant 0 : index
    %c0_28 = arith.constant 0 : index
    %33 = vector.load %arg11[%c0_27, %c0_28] : memref<32x64xf32, #tpu.memory_space<vmem>>, vector<32x64xf32>
    %cst_29 = arith.constant dense<0.000000e+00> : vector<32x128xf32>
    %34 = tpu.matmul %33, %30, %cst_29 {dimension_numbers = #tpu.dot_dimension_numbers<[1], [0], [0], [1], [0, 0, 1, 1], [], []>} : vector<32x64xf32>, vector<64x128xf32>, vector<32x128xf32> -> vector<32x128xf32>
    %35 = arith.maximumf %32, %34 : vector<32x128xf32>
    %36 = vector.extract_strided_slice %35 {offsets = [0, 0], sizes = [8, 128], strides = [1, 1]} : vector<32x128xf32> to vector<8x128xf32>
    %37 = vector.extract_strided_slice %35 {offsets = [8, 0], sizes = [8, 128], strides = [1, 1]} : vector<32x128xf32> to vector<8x128xf32>
    %38 = vector.extract_strided_slice %35 {offsets = [16, 0], sizes = [8, 128], strides = [1, 1]} : vector<32x128xf32> to vector<8x128xf32>
    %39 = vector.extract_strided_slice %35 {offsets = [24, 0], sizes = [8, 128], strides = [1, 1]} : vector<32x128xf32> to vector<8x128xf32>
    %40 = tpu.concatenate %36, %37, %38, %39 in 1 : vector<8x128xf32>, vector<8x128xf32>, vector<8x128xf32>, vector<8x128xf32> -> vector<8x512xf32>
    %c0_30 = arith.constant 0 : index
    %c0_31 = arith.constant 0 : index
    %41 = vector.load %arg12[%c0_30, %c0_31] : memref<512x512xf32, #tpu.memory_space<vmem>>, vector<512x512xf32>
    %cst_32 = arith.constant dense<0.000000e+00> : vector<8x512xf32>
    %42 = tpu.matmul %40, %41, %cst_32 {dimension_numbers = #tpu.dot_dimension_numbers<[1], [0], [0], [1], [0, 0, 1, 1], [], []>} : vector<8x512xf32>, vector<512x512xf32>, vector<8x512xf32> -> vector<8x512xf32>
    %c0_33 = arith.constant 0 : index
    %c0_34 = arith.constant 0 : index
    %c0_35 = arith.constant 0 : index
    %43 = vector.load %arg18[%c0_33, %c0_34, %c0_35] : memref<1x8x512xf32, #tpu.memory_space<vmem>>, vector<1x8x512xf32>
    %44 = vector.shape_cast %43 : vector<1x8x512xf32> to vector<8x512xf32>
    %45 = vector.shape_cast %42 : vector<8x512xf32> to vector<1x8x512xf32>
    tpu.vector_store %arg18[%c0_33, %c0_34, %c0_35], %45 {strides = array<i32>} : memref<1x8x512xf32, #tpu.memory_space<vmem>>, vector<1x8x512xf32>,
    %c0_36 = arith.constant 0 : index
    %c0_37 = arith.constant 0 : index
    %46 = vector.load %arg13[%c0_36, %c0_37] : memref<512x128xf32, #tpu.memory_space<vmem>>, vector<512x128xf32>
    %cst_38 = arith.constant dense<0.000000e+00> : vector<8x128xf32>
    %47 = tpu.matmul %42, %46, %cst_38 {dimension_numbers = #tpu.dot_dimension_numbers<[1], [0], [0], [1], [0, 0, 1, 1], [], []>} : vector<8x512xf32>, vector<512x128xf32>, vector<8x128xf32> -> vector<8x128xf32>
    %c0_39 = arith.constant 0 : index
    %c0_40 = arith.constant 0 : index
    %48 = vector.load %arg14[%c0_39, %c0_40] : memref<1x128xf32, #tpu.memory_space<vmem>>, vector<1x128xf32>
    %49 = vector.broadcast %48 : vector<1x128xf32> to vector<8x128xf32>
    %50 = arith.addf %47, %49 : vector<8x128xf32>
    %cst_41 = arith.constant 0.000000e+00 : f32
    %51 = vector.broadcast %cst_41 : f32 to vector<8x128xf32>
    %52 = arith.maximumf %50, %51 : vector<8x128xf32>
    %c0_42 = arith.constant 0 : index
    %c0_43 = arith.constant 0 : index
    %53 = vector.load %arg15[%c0_42, %c0_43] : memref<128x128xf32, #tpu.memory_space<vmem>>, vector<128x128xf32>
    %cst_44 = arith.constant dense<0.000000e+00> : vector<8x128xf32>
    %54 = tpu.matmul %52, %53, %cst_44 {dimension_numbers = #tpu.dot_dimension_numbers<[1], [0], [0], [1], [0, 0, 1, 1], [], []>} : vector<8x128xf32>, vector<128x128xf32>, vector<8x128xf32> -> vector<8x128xf32>
    %c0_45 = arith.constant 0 : index
    %c0_46 = arith.constant 0 : index
    %55 = vector.load %arg16[%c0_45, %c0_46] : memref<1x128xf32, #tpu.memory_space<vmem>>, vector<1x128xf32>
    %56 = vector.broadcast %55 : vector<1x128xf32> to vector<8x128xf32>
    %57 = arith.addf %54, %56 : vector<8x128xf32>
    %c0_47 = arith.constant 0 : index
    %c0_48 = arith.constant 0 : index
    %c0_49 = arith.constant 0 : index
    %58 = vector.load %arg17[%c0_47, %c0_48, %c0_49] : memref<1x8x128xf32, #tpu.memory_space<vmem>>, vector<1x8x128xf32>
    %59 = vector.shape_cast %58 : vector<1x8x128xf32> to vector<8x128xf32>
    %60 = vector.shape_cast %57 : vector<8x128xf32> to vector<1x8x128xf32>
    tpu.vector_store %arg17[%c0_47, %c0_48, %c0_49], %60 {strides = array<i32>} : memref<1x8x128xf32, #tpu.memory_space<vmem>>, vector<1x8x128xf32>,
    return
  }
  func.func @transform_0(%arg0: i32) -> (i32, i32) {
    %c0_i32 = arith.constant 0 : i32
    %c0_i32_0 = arith.constant 0 : i32
    return %arg0, %c0_i32 : i32, i32
  }
  func.func @transform_1(%arg0: i32) -> (i32, i32) {
    %c0_i32 = arith.constant 0 : i32
    %c0_i32_0 = arith.constant 0 : i32
    %c0_i32_1 = arith.constant 0 : i32
    return %c0_i32, %c0_i32_0 : i32, i32
  }
  func.func @transform_2(%arg0: i32) -> (i32, i32) {
    %c0_i32 = arith.constant 0 : i32
    %c0_i32_0 = arith.constant 0 : i32
    %c0_i32_1 = arith.constant 0 : i32
    return %c0_i32, %c0_i32_0 : i32, i32
  }
  func.func @transform_3(%arg0: i32) -> (i32, i32) {
    %c0_i32 = arith.constant 0 : i32
    %c0_i32_0 = arith.constant 0 : i32
    %c0_i32_1 = arith.constant 0 : i32
    return %c0_i32, %c0_i32_0 : i32, i32
  }
  func.func @transform_4(%arg0: i32) -> (i32, i32) {
    %c0_i32 = arith.constant 0 : i32
    %c0_i32_0 = arith.constant 0 : i32
    %c0_i32_1 = arith.constant 0 : i32
    return %c0_i32, %c0_i32_0 : i32, i32
  }
  func.func @transform_5(%arg0: i32) -> (i32, i32) {
    %c0_i32 = arith.constant 0 : i32
    %c0_i32_0 = arith.constant 0 : i32
    %c0_i32_1 = arith.constant 0 : i32
    return %c0_i32, %c0_i32_0 : i32, i32
  }
  func.func @transform_6(%arg0: i32) -> (i32, i32) {
    %c0_i32 = arith.constant 0 : i32
    %c0_i32_0 = arith.constant 0 : i32
    %c0_i32_1 = arith.constant 0 : i32
    return %c0_i32, %c0_i32_0 : i32, i32
  }
  func.func @transform_7(%arg0: i32) -> (i32, i32) {
    %c0_i32 = arith.constant 0 : i32
    %c0_i32_0 = arith.constant 0 : i32
    %c0_i32_1 = arith.constant 0 : i32
    return %c0_i32, %c0_i32_0 : i32, i32
  }
  func.func @transform_8(%arg0: i32) -> (i32, i32) {
    %c0_i32 = arith.constant 0 : i32
    %c0_i32_0 = arith.constant 0 : i32
    %c0_i32_1 = arith.constant 0 : i32
    return %c0_i32, %c0_i32_0 : i32, i32
  }
  func.func @transform_9(%arg0: i32) -> (i32, i32) {
    %c0_i32 = arith.constant 0 : i32
    %c0_i32_0 = arith.constant 0 : i32
    %c0_i32_1 = arith.constant 0 : i32
    return %c0_i32, %c0_i32_0 : i32, i32
  }
  func.func @transform_10(%arg0: i32) -> (i32, i32) {
    %c0_i32 = arith.constant 0 : i32
    %c0_i32_0 = arith.constant 0 : i32
    %c0_i32_1 = arith.constant 0 : i32
    return %c0_i32, %c0_i32_0 : i32, i32
  }
  func.func @transform_11(%arg0: i32) -> (i32, i32) {
    %c0_i32 = arith.constant 0 : i32
    %c0_i32_0 = arith.constant 0 : i32
    %c0_i32_1 = arith.constant 0 : i32
    return %c0_i32, %c0_i32_0 : i32, i32
  }
  func.func @transform_12(%arg0: i32) -> (i32, i32) {
    %c0_i32 = arith.constant 0 : i32
    %c0_i32_0 = arith.constant 0 : i32
    %c0_i32_1 = arith.constant 0 : i32
    return %c0_i32, %c0_i32_0 : i32, i32
  }
  func.func @transform_13(%arg0: i32) -> (i32, i32) {
    %c0_i32 = arith.constant 0 : i32
    %c0_i32_0 = arith.constant 0 : i32
    %c0_i32_1 = arith.constant 0 : i32
    return %c0_i32, %c0_i32_0 : i32, i32
  }
  func.func @transform_14(%arg0: i32) -> (i32, i32) {
    %c0_i32 = arith.constant 0 : i32
    %c0_i32_0 = arith.constant 0 : i32
    %c0_i32_1 = arith.constant 0 : i32
    return %c0_i32, %c0_i32_0 : i32, i32
  }
  func.func @transform_15(%arg0: i32) -> (i32, i32) {
    %c0_i32 = arith.constant 0 : i32
    %c0_i32_0 = arith.constant 0 : i32
    %c0_i32_1 = arith.constant 0 : i32
    return %c0_i32, %c0_i32_0 : i32, i32
  }
  func.func @transform_16(%arg0: i32) -> (i32, i32, i32) {
    %c0_i32 = arith.constant 0 : i32
    %c0_i32_0 = arith.constant 0 : i32
    %c0_i32_1 = arith.constant 0 : i32
    return %arg0, %c0_i32, %c0_i32_0 : i32, i32, i32
  }
  func.func @transform_17(%arg0: i32) -> (i32, i32, i32) {
    %c0_i32 = arith.constant 0 : i32
    %c0_i32_0 = arith.constant 0 : i32
    %c0_i32_1 = arith.constant 0 : i32
    return %arg0, %c0_i32, %c0_i32_0 : i32, i32, i32
  }
}

</mosaic_0001>

<bundles_post_ra>
// kernel: simple_stt_forward.1
= control target key start
LH: loop header
LB: loop body
LE: loop exit
PB: predicated region body
PF: predicated region fallthrough
CT: control target
= control target key end

     0   :  { %s2985_s0 = inlined_call_operand.vmem [shape: f32[128,48], index: 0, kind: input, shape index: {}]   ;;  %s2986_s1 = inlined_call_operand.vmem [shape: f32[48,256], index: 1, kind: input, shape index: {}]   ;;  %s2987_s2 = inlined_call_operand.vmem [shape: f32[1,256], index: 2, kind: input, shape index: {}]   ;;  %s2988_s3 = inlined_call_operand.vmem [shape: f32[64,128], index: 3, kind: input, shape index: {}]   ;;  %s2989_s4 = inlined_call_operand.vmem [shape: f32[64,128], index: 4, kind: input, shape index: {}]   ;;  %s2990_s5 = inlined_call_operand.vmem [shape: f32[64,64], index: 5, kind: input, shape index: {}]   ;;  %s2991_s6 = inlined_call_operand.hbm [shape: f32[64,64], index: 6, kind: input, shape index: {}]   ;;  %s2992_s7 = inlined_call_operand.hbm [shape: f32[384,256], index: 7, kind: input, shape index: {}]   ;;  %s2993_s8 = inlined_call_operand.vmem [shape: f32[1,256], index: 8, kind: input, shape index: {}]   ;;  %s2994_s9 = inlined_call_operand.vmem [shape: f32[32,64], index: 9, kind: input, shape index: {}]   ;;  %s2995_s10 = inlined_call_operand.hbm [shape: f32[32,64], index: 10, kind: input, shape index: {}]   ;;  %s2996_s11 = inlined_call_operand.hbm [shape: f32[512,512], index: 11, kind: input, shape index: {}]   ;;  %s2997_s12 = inlined_call_operand.vmem [shape: f32[512,128], index: 12, kind: input, shape index: {}]   ;;  %s2998_s13 = inlined_call_operand.vmem [shape: f32[1,128], index: 13, kind: input, shape index: {}]   ;;  %s2999_s14 = inlined_call_operand.vmem [shape: f32[128,128], index: 14, kind: input, shape index: {}]   ;;  %s3000_s15 = inlined_call_operand.hbm [shape: f32[1,128], index: 15, kind: input, shape index: {}]   ;;  %s3001_s16 = inlined_call_operand.hbm [shape: f32[1,8,128], index: 16, kind: output, shape index: {0}]   ;;  %s3002_s17 = inlined_call_operand.hbm [shape: f32[1,8,512], index: 17, kind: output, shape index: {1}]  }
   0x1   :  { %3005 = sst [smem:[#allocation19_spill]] %s2985_s0 }
   0x2   :  { %3006 = sst [smem:[#allocation20_spill]] %s2986_s1 }
   0x3   :  { %23 = vsyncpa [#allocation3], 0 }
   0x4   :  { %24 = vsyncpa [#allocation6], 0 }
   0x5   :  { %25 = vsyncpa [#allocation9], 0 }
   0x6   :  { %26 = vsyncpa [#allocation4], 0  ;;  %s57_s26 = sshll.u32 %s2992_s7, 4  ;;  %s58_s26 = int_to_ptr.hbm [resolvable:$true] %s57_s26 }
   0x7   :  { %27 = vsyncpa [#allocation13], 0  ;;  %s2175_s27 = smov [#allocation5]   ;;  %s87_s30 = sshll.u32 %s2996_s11, 4  ;;  %s88_s30 = int_to_ptr.hbm [resolvable:$true] %s87_s30 }
   0x8   :  { %s59_s28 = sshll.u32 %s2175_s27, 4  ;;  %s2176_s18 = smov 256   ;;  %s60_s28 = int_to_ptr.vmem [resolvable:$true] %s59_s28 }
   0x9   :  { %s2177_s19 = smov 16   ;;  %s2178_s1 = smov [#allocation8]  }
   0xa   :  { %65 = dma.hbm_to_vmem [thread:$0]  %s58_s26, 12288, %s60_s28, [#allocation6], %s2176_s18, %s2176_s18, %s2177_s19  }
   0xb   :  { %s89_s20 = sshll.u32 %s2178_s1, 4  ;;  %s2179_s21 = smov 512   ;;  %s90_s20 = int_to_ptr.vmem [resolvable:$true] %s89_s20 }
   0xc   :  { %s2180_s22 = smov 32   ;;  %s44_s24 = sshll.u32 %s2991_s6, 4  ;;  %s45_s24 = int_to_ptr.hbm [resolvable:$true] %s44_s24 }
   0xd   :  { %95 = dma.hbm_to_vmem [thread:$0]  %s88_s30, 32768, %s90_s20, [#allocation9], %s2179_s21, %s2179_s21, %s2180_s22  }
   0xe   :  { %s2181_s25 = smov [#allocation2]   ;;  %s74_s0 = sshll.u32 %s2995_s10, 4  ;;  %s75_s0 = int_to_ptr.hbm [resolvable:$true] %s74_s0 }
   0xf   :  { %s46_s27 = sshll.u32 %s2181_s25, 4  ;;  %s2182_s26 = smov 128   ;;  %s47_s27 = int_to_ptr.vmem [resolvable:$true] %s46_s27 }
  0x10   :  { %s2183_s28 = smov 8   ;;  %s2184_s18 = smov [#allocation7]  }
  0x11   :  { %52 = dma.hbm_to_vmem [thread:$0]  %s45_s24, 1024, %s47_s27, [#allocation3], %s2182_s26, %s2182_s26, %s2183_s28  }
  0x12   :  { %s76_s19 = sshll.u32 %s2184_s18, 4  ;;  %s107_s20 = sshll.u32 %s3000_s15, 4  ;;  %s77_s19 = int_to_ptr.vmem [resolvable:$true] %s76_s19  ;;  %s108_s20 = int_to_ptr.hbm [resolvable:$true] %s107_s20 }
  0x13   :  { %82 = dma.hbm_to_vmem [thread:$0]  %s75_s0, 512, %s77_s19, [#allocation6], %s2182_s26, %s2182_s26, %s2183_s28  }
  0x14   :  { %s2185_s6 = smov [#allocation10]  }
  0x15   :  { %s109_s21 = sshll.u32 %s2185_s6, 4  ;;  %s110_s21 = int_to_ptr.vmem [resolvable:$true] %s109_s21 }
  0x16   :  { %112 = dma.hbm_to_vmem [thread:$0]  %s108_s20, 16, %s110_s21, [#allocation9]  }
  0x17   :  { %2165 = dma.done.wait [#allocation3], 1024  }
  0x18   :  { %2166 = vsyncadd [#allocation3], 4294966272 }
  0x19   :  { %2167 = dma.done.wait [#allocation6], 12800  }
  0x1a   :  { %2168 = vsyncadd [#allocation6], 4294954496 }
  0x1b   :  { %2169 = dma.done.wait [#allocation9], 32784  }
  0x1c   :  { %2170 = vsyncadd [#allocation9], 4294934512  ;;  %s3007_s7 = sld [smem:[#allocation20_spill]]  ;;  %vm167_vm0 = vcmask 392192   ;;  %v161_v58 = vld [vmem:[%s2987_s2] sm:$0x3] }
  0x1d   :  { %s3008_s29 = sld [smem:[#allocation19_spill]]  ;;  %v2440_v59 = vperm.slane %v161_v58, 0  ;;  %v2442_v60 = vperm.slane %v161_v58, 1  ;;  %vm508_vm1 = vcmask 523264   ;;  %s2186_s18 = smov [#allocation12]  }
  0x1e   :  { %s1899_s19 = sshll.u32 %s2186_s18, 4  ;;  %s1901_s30 = sshll.u32 %s3002_s17, 4  ;;  %s1900_s19 = int_to_ptr.vmem [resolvable:$true] %s1899_s19  ;;  %s1902_s30 = int_to_ptr.hbm [resolvable:$true] %s1901_s30 }
  0x1f   :  { %s1890_s21 = sshll.u32 %s3001_s16, 4  ;;  %s1891_s21 = int_to_ptr.hbm [resolvable:$true] %s1890_s21 }
  0x22   :  { %v159_v0 = vld [vmem:[%s3007_s7 + $0x50] sm:$0xff]  ;;  %v160_v1 = vld [vmem:[%s3007_s7 + $0x58] sm:$0xff]  ;;  %v157_v2 = vld [vmem:[%s3007_s7 + $0x40] sm:$0xff] }
  0x23   :  { %226 = vmatpush.msra.mxu0 %v159_v0  ;;  %291 = vmatpush.msra.mxu1 %v160_v1  ;;  %v158_v3 = vld [vmem:[%s3007_s7 + $0x48] sm:$0xff]  ;;  %v155_v4 = vld [vmem:[%s3007_s7 + $0x30] sm:$0xff]  ;;  %v156_v5 = vld [vmem:[%s3007_s7 + $0x38] sm:$0xff] }
  0x24   :  { %v153_v6 = vld [vmem:[%s3007_s7 + $0x20] sm:$0xff]  ;;  %v154_v7 = vld [vmem:[%s3007_s7 + $0x28] sm:$0xff]  ;;  %v151_v8 = vld [vmem:[%s3007_s7 + $0x10] sm:$0xff] }
  0x25   :  { %227 = vmatpush.msra.mxu0 %v157_v2  ;;  %292 = vmatpush.msra.mxu1 %v158_v3  ;;  %v152_v9 = vld [vmem:[%s3007_s7 + $0x18] sm:$0xff]  ;;  %v149_v10 = vld [vmem:[%s3007_s7] sm:$0xff]  ;;  %v150_v11 = vld [vmem:[%s3007_s7 + $0x8] sm:$0xff] }
  0x26   :  { %v133_v12 = vld [vmem:[%s3008_s29] sm:$0xff]  ;;  %v134_v13 = vld [vmem:[%s3008_s29 + $0x8] sm:$0xff]  ;;  %v135_v14 = vld [vmem:[%s3008_s29 + $0x10] sm:$0xff] }
  0x27   :  { %228 = vmatpush.msra.mxu0 %v155_v4  ;;  %293 = vmatpush.msra.mxu1 %v156_v5  ;;  %v136_v15 = vld [vmem:[%s3008_s29 + $0x18] sm:$0xff]  ;;  %v137_v16 = vld [vmem:[%s3008_s29 + $0x20] sm:$0xff]  ;;  %v138_v17 = vld [vmem:[%s3008_s29 + $0x28] sm:$0xff] }
  0x28   :  { %v139_v18 = vld [vmem:[%s3008_s29 + $0x30] sm:$0xff]  ;;  %v140_v19 = vld [vmem:[%s3008_s29 + $0x38] sm:$0xff]  ;;  %v141_v20 = vld [vmem:[%s3008_s29 + $0x40] sm:$0xff] }
  0x29   :  { %229 = vmatpush.msra.mxu0 %v153_v6  ;;  %294 = vmatpush.msra.mxu1 %v154_v7  ;;  %v142_v21 = vld [vmem:[%s3008_s29 + $0x48] sm:$0xff]  ;;  %v143_v22 = vld [vmem:[%s3008_s29 + $0x50] sm:$0xff]  ;;  %v144_v23 = vld [vmem:[%s3008_s29 + $0x58] sm:$0xff] }
  0x2a   :  { %v145_v24 = vld [vmem:[%s3008_s29 + $0x60] sm:$0xff]  ;;  %v146_v25 = vld [vmem:[%s3008_s29 + $0x68] sm:$0xff]  ;;  %v147_v26 = vld [vmem:[%s3008_s29 + $0x70] sm:$0xff] }
  0x2b   :  { %230 = vmatpush.msra.mxu0 %v151_v8  ;;  %295 = vmatpush.msra.mxu1 %v152_v9  ;;  %v148_v27 = vld [vmem:[%s3008_s29 + $0x78] sm:$0xff] }
  0x2d   :  { %231 = vmatpush.msra.mxu0 %v149_v10  ;;  %296 = vmatpush.msra.mxu1 %v150_v11 }
  0x2e   :  { %1918 = vmatmul.msk.f32.vlgmr.msra.gmra.mxu0 %vm167_vm0, %v133_v12  ;;  %1934 = vmatmul.msk.f32.vlgmr.msra.gmra.mxu1 %vm167_vm0, %v133_v12 }
  0x36   :  { %1919 = vmatmul.msk.f32.gmra.mxu0 %vm167_vm0, %v134_v13  ;;  %1935 = vmatmul.msk.f32.gmra.mxu1 %vm167_vm0, %v134_v13 }
  0x3e   :  { %1920 = vmatmul.msk.f32.gmra.mxu0 %vm167_vm0, %v135_v14  ;;  %1936 = vmatmul.msk.f32.gmra.mxu1 %vm167_vm0, %v135_v14 }
  0x46   :  { %1921 = vmatmul.msk.f32.gmra.mxu0 %vm167_vm0, %v136_v15  ;;  %1937 = vmatmul.msk.f32.gmra.mxu1 %vm167_vm0, %v136_v15 }
  0x4e   :  { %1922 = vmatmul.msk.f32.gmra.mxu0 %vm167_vm0, %v137_v16  ;;  %1938 = vmatmul.msk.f32.gmra.mxu1 %vm167_vm0, %v137_v16 }
  0x56   :  { %1923 = vmatmul.msk.f32.gmra.mxu0 %vm167_vm0, %v138_v17  ;;  %1939 = vmatmul.msk.f32.gmra.mxu1 %vm167_vm0, %v138_v17 }
  0x5e   :  { %1924 = vmatmul.msk.f32.gmra.mxu0 %vm167_vm0, %v139_v18  ;;  %1940 = vmatmul.msk.f32.gmra.mxu1 %vm167_vm0, %v139_v18 }
  0x66   :  { %1925 = vmatmul.msk.f32.gmra.mxu0 %vm167_vm0, %v140_v19  ;;  %1941 = vmatmul.msk.f32.gmra.mxu1 %vm167_vm0, %v140_v19 }
  0x6e   :  { %1926 = vmatmul.msk.f32.gmra.mxu0 %vm167_vm0, %v141_v20  ;;  %1942 = vmatmul.msk.f32.gmra.mxu1 %vm167_vm0, %v141_v20 }
  0x76   :  { %1927 = vmatmul.msk.f32.gmra.mxu0 %vm167_vm0, %v142_v21  ;;  %1943 = vmatmul.msk.f32.gmra.mxu1 %vm167_vm0, %v142_v21 }
  0x7e   :  { %1928 = vmatmul.msk.f32.gmra.mxu0 %vm167_vm0, %v143_v22  ;;  %1944 = vmatmul.msk.f32.gmra.mxu1 %vm167_vm0, %v143_v22 }
  0x86   :  { %1929 = vmatmul.msk.f32.gmra.mxu0 %vm167_vm0, %v144_v23  ;;  %1945 = vmatmul.msk.f32.gmra.mxu1 %vm167_vm0, %v144_v23 }
  0x8e   :  { %1930 = vmatmul.msk.f32.gmra.mxu0 %vm167_vm0, %v145_v24  ;;  %1946 = vmatmul.msk.f32.gmra.mxu1 %vm167_vm0, %v145_v24 }
  0x96   :  { %1931 = vmatmul.msk.f32.gmra.mxu0 %vm167_vm0, %v146_v25  ;;  %1947 = vmatmul.msk.f32.gmra.mxu1 %vm167_vm0, %v146_v25 }
  0x9e   :  { %1932 = vmatmul.msk.f32.gmra.mxu0 %vm167_vm0, %v147_v26  ;;  %1948 = vmatmul.msk.f32.gmra.mxu1 %vm167_vm0, %v147_v26 }
  0xa6   :  { %1933 = vmatmul.msk.f32.gmra.mxu0 %vm167_vm0, %v148_v27  ;;  %1949 = vmatmul.msk.f32.gmra.mxu1 %vm167_vm0, %v148_v27 }
  0xab   :  { %v2409_v28 = vpop.f32.mrf.mxu0  ;;  %v2411_v29 = vpop.f32.mrf.mxu1 }
  0xb3   :  { %v2413_v30 = vpop.f32.mrf.mxu0  ;;  %v2415_v31 = vpop.f32.mrf.mxu1 }
  0xbb   :  { %v2417_v32 = vpop.f32.mrf.mxu0  ;;  %v2419_v33 = vpop.f32.mrf.mxu1 }
  0xc3   :  { %v2421_v34 = vpop.f32.mrf.mxu0  ;;  %v2423_v35 = vpop.f32.mrf.mxu1 }
  0xcb   :  { %v2425_v36 = vpop.f32.mrf.mxu0  ;;  %v2427_v37 = vpop.f32.mrf.mxu1 }
  0xd3   :  { %v2429_v38 = vpop.f32.mrf.mxu0  ;;  %v2431_v39 = vpop.f32.mrf.mxu1 }
  0xdb   :  { %v2433_v40 = vpop.f32.mrf.mxu0  ;;  %v2435_v41 = vpop.f32.mrf.mxu1 }
  0xe3   :  { %v254_v42 = vpop.f32.mrf.mxu0  ;;  %v319_v43 = vpop.f32.mrf.mxu1 }
  0xeb   :  { %v257_v44 = vpop.f32.mrf.mxu0  ;;  %v322_v45 = vpop.f32.mrf.mxu1 }
  0xec   :  { %v258_v26 = vadd.f32 %v257_v44, %v2440_v59  ;;  %v323_v27 = vadd.f32 %v322_v45, %v2442_v60  ;;  %v317_v44 = vadd.f32 %v2435_v41, %v2442_v60  ;;  %v311_v41 = vadd.f32 %v2427_v37, %v2442_v60 }
  0xed   :  { %v305_v37 = vadd.f32 %v2419_v33, %v2442_v60  ;;  %v299_v33 = vadd.f32 %v2411_v29, %v2442_v60 }
  0xee   :  { %v362_v45 = vmax.f32 %v258_v26, 0.0  ;;  %v703_v26 = vld [vmem:[#allocation5 + $0x1c0] sm:$0xff] }
  0xf3   :  { %v260_v46 = vpop.f32.mrf.mxu0  ;;  %v325_v47 = vpop.f32.mrf.mxu1 }
  0xf4   :  { %v261_v21 = vadd.f32 %v260_v46, %v2440_v59  ;;  %v326_v22 = vadd.f32 %v325_v47, %v2442_v60  ;;  %v320_v46 = vadd.f32 %v319_v43, %v2442_v60  ;;  %v314_v43 = vadd.f32 %v2431_v39, %v2442_v60 }
  0xf5   :  { %v308_v39 = vadd.f32 %v2423_v35, %v2442_v60  ;;  %v302_v35 = vadd.f32 %v2415_v31, %v2442_v60 }
  0xf6   :  { %v365_v47 = vmax.f32 %v326_v22, 0.0  ;;  %v361_v58 = vmax.f32 %v320_v46, 0.0  ;;  %v446_v22 = vld [vmem:[%s2989_s4 + $0x18] sm:$0xff]  ;;  %v695_v46 = vld [vmem:[#allocation5 + $0x180] sm:$0xff] }
  0xfb   :  { %v263_v48 = vpop.f32.mrf.mxu0  ;;  %v328_v49 = vpop.f32.mrf.mxu1 }
  0xfc   :  { %v264_v16 = vadd.f32 %v263_v48, %v2440_v59  ;;  %v329_v17 = vadd.f32 %v328_v49, %v2442_v60 }
  0xfe   :  { %v366_v48 = vmax.f32 %v264_v16, 0.0  ;;  %v367_v49 = vmax.f32 %v329_v17, 0.0  ;;  %v395_v17 = vld [vmem:[%s2988_s3 + $0x8] sm:$0xff] }
 0x103   :  { %v266_v50 = vpop.f32.mrf.mxu0  ;;  %v331_v51 = vpop.f32.mrf.mxu1 }
 0x104   :  { %v267_v11 = vadd.f32 %v266_v50, %v2440_v59  ;;  %v332_v12 = vadd.f32 %v331_v51, %v2442_v60  ;;  %v255_v51 = vadd.f32 %v254_v42, %v2440_v59  ;;  %v249_v42 = vadd.f32 %v2429_v38, %v2440_v59 }
 0x105   :  { %v243_v38 = vadd.f32 %v2421_v34, %v2440_v59  ;;  %v237_v34 = vadd.f32 %v2413_v30, %v2440_v59 }
 0x106   :  { %v368_v23 = vmax.f32 %v267_v11, 0.0  ;;  %v369_v24 = vmax.f32 %v332_v12, 0.0  ;;  %v351_v11 = vmax.f32 %v305_v37, 0.0 }
 0x107   :  { %v348_v30 = vmax.f32 %v237_v34, 0.0 }
 0x10b   :  { %v269_v52 = vpop.f32.mrf.mxu0  ;;  %v334_v53 = vpop.f32.mrf.mxu1 }
 0x10c   :  { %v270_v5 = vadd.f32 %v269_v52, %v2440_v59  ;;  %v335_v6 = vadd.f32 %v334_v53, %v2442_v60  ;;  %v364_v52 = vmax.f32 %v261_v21, 0.0  ;;  %v389_v53 = vmax.f32 %v368_v23, %v369_v24  ;;  %v397_v21 = vld [vmem:[%s2988_s3 + $0x18] sm:$0xff]  ;;  %v709_v23 = vld [vmem:[#allocation5 + $0x1f0] sm:$0xff]  ;;  %v707_v24 = vld [vmem:[#allocation5 + $0x1e0] sm:$0xff] }
 0x10d   :  { %790 = vmatpush.msrb.mxu1 %v709_v23  ;;  %v578_v23 = vld [vmem:[#allocation2 + $0x20] sm:$0xff] }
 0x10e   :  { %v370_v18 = vmax.f32 %v270_v5, 0.0  ;;  %v371_v19 = vmax.f32 %v335_v6, 0.0  ;;  %v355_v5 = vmax.f32 %v311_v41, 0.0 }
 0x10f   :  { %791 = vmatpush.msrb.mxu1 %v707_v24  ;;  %v669_v24 = vld [vmem:[#allocation5 + $0xb0] sm:$0xff] }
 0x110   :  { %v390_v50 = vmax.f32 %v370_v18, %v371_v19  ;;  %v444_v18 = vld [vmem:[%s2989_s4 + $0x8] sm:$0xff]  ;;  %v396_v19 = vld [vmem:[%s2988_s3 + $0x10] sm:$0xff] }
 0x113   :  { %v272_v54 = vpop.f32.mrf.mxu0  ;;  %v337_v55 = vpop.f32.mrf.mxu1 }
 0x114   :  { %v273_v1 = vadd.f32 %v272_v54, %v2440_v59  ;;  %v338_v2 = vadd.f32 %v337_v55, %v2442_v60  ;;  %v252_v54 = vadd.f32 %v2433_v40, %v2440_v59  ;;  %v363_v55 = vmax.f32 %v323_v27, 0.0  ;;  %v398_v27 = vld [vmem:[%s2988_s3 + $0x20] sm:$0xff] }
 0x115   :  { %v246_v40 = vadd.f32 %v2425_v36, %v2440_v59  ;;  %v240_v36 = vadd.f32 %v2417_v32, %v2440_v59  ;;  %v234_v32 = vadd.f32 %v2409_v28, %v2440_v59 }
 0x116   :  { %v372_v13 = vmax.f32 %v273_v1, 0.0  ;;  %v373_v14 = vmax.f32 %v338_v2, 0.0  ;;  %v356_v1 = vmax.f32 %v249_v42, 0.0  ;;  %v357_v2 = vmax.f32 %v314_v43, 0.0  ;;  %v685_v42 = vld [vmem:[#allocation5 + $0x130] sm:$0xff]  ;;  %v683_v43 = vld [vmem:[#allocation5 + $0x120] sm:$0xff] }
 0x118   :  { %v391_v25 = vmax.f32 %v372_v13, %v373_v14  ;;  %v349_v13 = vmax.f32 %v302_v35, 0.0  ;;  %v346_v14 = vmax.f32 %v234_v32, 0.0 }
 0x11a   :  { %v379_v28 = vmax.f32 %v348_v30, %v349_v13  ;;  %v500_v30 = vld [vmem:[%s2990_s5] sm:$0xff]  ;;  %v506_v13 = vld [vmem:[%s2990_s5 + $0x30] sm:$0xff] }
 0x11b   :  { %v275_v56 = vpop.f32.mrf.mxu0  ;;  %v340_v57 = vpop.f32.mrf.mxu1 }
 0x11c   :  { %v276_v61 = vadd.f32 %v275_v56, %v2440_v59  ;;  %v341_v62 = vadd.f32 %v340_v57, %v2442_v60  ;;  %v388_v56 = vmax.f32 %v366_v48, %v367_v49  ;;  %v360_v57 = vmax.f32 %v255_v51, 0.0  ;;  %v447_v48 = vld [vmem:[%s2989_s4 + $0x20] sm:$0xff]  ;;  %v701_v49 = vld [vmem:[#allocation5 + $0x1b0] sm:$0xff] }
 0x11d   :  { %v697_v51 = vld [vmem:[#allocation5 + $0x190] sm:$0xff] }
 0x11e   :  { %v374_v7 = vmax.f32 %v276_v61, 0.0  ;;  %v375_v8 = vmax.f32 %v341_v62, 0.0  ;;  %v387_v61 = vmax.f32 %v364_v52, %v365_v47  ;;  %v358_v62 = vmax.f32 %v252_v54, 0.0  ;;  %v399_v52 = vld [vmem:[%s2988_s3 + $0x28] sm:$0xff]  ;;  %v691_v54 = vld [vmem:[#allocation5 + $0x160] sm:$0xff] }
 0x11f   :  { %v448_v47 = vld [vmem:[%s2989_s4 + $0x28] sm:$0xff] }
 0x120   :  { %v392_v20 = vmax.f32 %v374_v7, %v375_v8  ;;  %v352_v7 = vmax.f32 %v243_v38, 0.0  ;;  %v353_v8 = vmax.f32 %v308_v39, 0.0 }
 0x122   :  { %v381_v31 = vmax.f32 %v352_v7, %v353_v8 }
 0x123   :  { %v278_v63 = vpop.f32.mrf.mxu0  ;;  %v343_v0 = vpop.f32.mrf.mxu1 }
 0x124   :  { %v279_v3 = vadd.f32 %v278_v63, %v2440_v59  ;;  %v344_v4 = vadd.f32 %v343_v0, %v2442_v60  ;;  %v359_v63 = vmax.f32 %v317_v44, 0.0  ;;  %v386_v0 = vmax.f32 %v362_v45, %v363_v55  ;;  %v394_v59 = vld [vmem:[%s2988_s3] sm:$0xff]  ;;  %v689_v44 = vld [vmem:[#allocation5 + $0x150] sm:$0xff] }
 0x125   :  { %v443_v60 = vld [vmem:[%s2989_s4] sm:$0xff]  ;;  %v400_v55 = vld [vmem:[%s2988_s3 + $0x30] sm:$0xff] }
 0x126   :  { %v376_v9 = vmax.f32 %v279_v3, 0.0  ;;  %v377_v10 = vmax.f32 %v344_v4, 0.0  ;;  %v385_v3 = vmax.f32 %v360_v57, %v361_v58  ;;  %v354_v4 = vmax.f32 %v246_v40, 0.0  ;;  %v687_v45 = vld [vmem:[#allocation5 + $0x140] sm:$0xff]  ;;  %v401_v57 = vld [vmem:[%s2988_s3 + $0x38] sm:$0xff] }
 0x127   :  { %v384_v6 = vmax.f32 %v358_v62, %v359_v63  ;;  %v450_v58 = vld [vmem:[%s2989_s4 + $0x38] sm:$0xff]  ;;  %v679_v40 = vld [vmem:[#allocation5 + $0x100] sm:$0xff] }
 0x128   :  { %v393_v15 = vmax.f32 %v376_v9, %v377_v10  ;;  %v383_v9 = vmax.f32 %v356_v1, %v357_v2  ;;  %v350_v10 = vmax.f32 %v240_v36, 0.0  ;;  %v382_v12 = vmax.f32 %v354_v4, %v355_v5 }
 0x12a   :  { %402 = vmatpush.msra.mxu2 %v393_v15  ;;  %451 = vmatpush.msra.mxu3 %v393_v15  ;;  %v347_v15 = vmax.f32 %v299_v33, 0.0  ;;  %v380_v16 = vmax.f32 %v350_v10, %v351_v11 }
 0x12c   :  { %403 = vmatpush.msra.mxu2 %v392_v20  ;;  %452 = vmatpush.msra.mxu3 %v392_v20  ;;  %v378_v29 = vmax.f32 %v346_v14, %v347_v15  ;;  %v445_v20 = vld [vmem:[%s2989_s4 + $0x10] sm:$0xff]  ;;  %v507_v14 = vld [vmem:[%s2990_s5 + $0x38] sm:$0xff] }
 0x12d   :  { %v502_v15 = vld [vmem:[%s2990_s5 + $0x10] sm:$0xff] }
 0x12e   :  { %404 = vmatpush.msra.mxu2 %v391_v25  ;;  %453 = vmatpush.msra.mxu3 %v391_v25  ;;  %v705_v25 = vld [vmem:[#allocation5 + $0x1d0] sm:$0xff] }
 0x12f   :  { %792 = vmatpush.msrb.mxu1 %v705_v25  ;;  %v579_v25 = vld [vmem:[#allocation2 + $0x28] sm:$0xff] }
 0x130   :  { %405 = vmatpush.msra.mxu2 %v390_v50  ;;  %454 = vmatpush.msra.mxu3 %v390_v50  ;;  %v699_v50 = vld [vmem:[#allocation5 + $0x1a0] sm:$0xff] }
 0x131   :  { %793 = vmatpush.msrb.mxu1 %v703_v26  ;;  %v667_v26 = vld [vmem:[#allocation5 + $0xa0] sm:$0xff] }
 0x132   :  { %406 = vmatpush.msra.mxu2 %v389_v53  ;;  %455 = vmatpush.msra.mxu3 %v389_v53  ;;  %v693_v53 = vld [vmem:[#allocation5 + $0x170] sm:$0xff] }
 0x133   :  { %794 = vmatpush.msrb.mxu1 %v701_v49  ;;  %v678_v49 = vld [vmem:[#allocation5 + $0xf8] sm:$0xff] }
 0x134   :  { %407 = vmatpush.msra.mxu2 %v388_v56  ;;  %456 = vmatpush.msra.mxu3 %v388_v56  ;;  %v449_v56 = vld [vmem:[%s2989_s4 + $0x30] sm:$0xff] }
 0x135   :  { %795 = vmatpush.msrb.mxu1 %v699_v50  ;;  %v581_v50 = vld [vmem:[#allocation2 + $0x38] sm:$0xff] }
 0x136   :  { %408 = vmatpush.msra.mxu2 %v387_v61  ;;  %457 = vmatpush.msra.mxu3 %v387_v61  ;;  %v681_v61 = vld [vmem:[#allocation5 + $0x110] sm:$0xff] }
 0x137   :  { %796 = vmatpush.msrb.mxu1 %v697_v51  ;;  %v676_v51 = vld [vmem:[#allocation5 + $0xe8] sm:$0xff] }
 0x138   :  { %409 = vmatpush.msra.mxu2 %v386_v0  ;;  %458 = vmatpush.msra.mxu3 %v386_v0 }
 0x139   :  { %797 = vmatpush.msrb.mxu1 %v695_v46  ;;  %v674_v46 = vld [vmem:[#allocation5 + $0xd8] sm:$0xff] }
 0x13a   :  { %410 = vmatpush.msra.mxu2 %v385_v3  ;;  %459 = vmatpush.msra.mxu3 %v385_v3 }
 0x13b   :  { %798 = vmatpush.msrb.mxu1 %v693_v53  ;;  %v670_v53 = vld [vmem:[#allocation5 + $0xb8] sm:$0xff] }
 0x13c   :  { %411 = vmatpush.msra.mxu2 %v384_v6  ;;  %460 = vmatpush.msra.mxu3 %v384_v6 }
 0x13d   :  { %799 = vmatpush.msrb.mxu1 %v691_v54  ;;  %v668_v54 = vld [vmem:[#allocation5 + $0xa8] sm:$0xff] }
 0x13e   :  { %412 = vmatpush.msra.mxu2 %v383_v9  ;;  %461 = vmatpush.msra.mxu3 %v383_v9 }
 0x13f   :  { %800 = vmatpush.msrb.mxu1 %v689_v44  ;;  %v666_v44 = vld [vmem:[#allocation5 + $0x98] sm:$0xff] }
 0x140   :  { %413 = vmatpush.msra.mxu2 %v382_v12  ;;  %462 = vmatpush.msra.mxu3 %v382_v12 }
 0x141   :  { %801 = vmatpush.msrb.mxu1 %v687_v45  ;;  %v661_v45 = vld [vmem:[#allocation5 + $0x70] sm:$0xff] }
 0x142   :  { %414 = vmatpush.msra.mxu2 %v381_v31  ;;  %463 = vmatpush.msra.mxu3 %v381_v31  ;;  %v501_v31 = vld [vmem:[%s2990_s5 + $0x8] sm:$0xff] }
 0x143   :  { %802 = vmatpush.msrb.mxu1 %v685_v42  ;;  %v659_v42 = vld [vmem:[#allocation5 + $0x60] sm:$0xff] }
 0x144   :  { %415 = vmatpush.msra.mxu2 %v380_v16  ;;  %464 = vmatpush.msra.mxu3 %v380_v16  ;;  %v574_v16 = vld [vmem:[#allocation2] sm:$0xff] }
 0x145   :  { %803 = vmatpush.msrb.mxu1 %v683_v43  ;;  %v739_v43 = vld [vmem:[#allocation5 + $0x2e0] sm:$0xff] }
 0x146   :  { %416 = vmatpush.msra.mxu2 %v379_v28  ;;  %465 = vmatpush.msra.mxu3 %v379_v28  ;;  %v677_v28 = vld [vmem:[#allocation5 + $0xf0] sm:$0xff] }
 0x147   :  { %804 = vmatpush.msrb.mxu1 %v681_v61  ;;  %749 = vmatpush.msrb.mxu0 %v677_v28  ;;  %v662_v61 = vld [vmem:[#allocation5 + $0x78] sm:$0xff]  ;;  %v713_v28 = vld [vmem:[#allocation5 + $0x210] sm:$0xff] }
 0x148   :  { %417 = vmatpush.msra.mxu2 %v378_v29  ;;  %466 = vmatpush.msra.mxu3 %v378_v29  ;;  %v503_v29 = vld [vmem:[%s2990_s5 + $0x18] sm:$0xff] }
 0x149   :  { %418 = vmatmul.f32.vlgmr.msra.gmra.mxu2 %v394_v59  ;;  %467 = vmatmul.f32.vlgmr.msra.gmra.mxu3 %v443_v60  ;;  %v575_v59 = vld [vmem:[#allocation2 + $0x8] sm:$0xff]  ;;  %v675_v60 = vld [vmem:[#allocation5 + $0xe0] sm:$0xff] }
 0x14a   :  { %805 = vmatpush.msrb.mxu1 %v679_v40  ;;  %750 = vmatpush.msrb.mxu0 %v675_v60  ;;  %v655_v40 = vld [vmem:[#allocation5 + $0x40] sm:$0xff] }
 0x151   :  { %421 = vmatmul.f32.gmra.mxu2 %v395_v17  ;;  %470 = vmatmul.f32.gmra.mxu3 %v444_v18  ;;  %v504_v17 = vld [vmem:[%s2990_s5 + $0x20] sm:$0xff]  ;;  %v576_v18 = vld [vmem:[#allocation2 + $0x10] sm:$0xff] }
 0x159   :  { %424 = vmatmul.f32.gmra.mxu2 %v396_v19  ;;  %473 = vmatmul.f32.gmra.mxu3 %v445_v20  ;;  %v673_v19 = vld [vmem:[#allocation5 + $0xd0] sm:$0xff]  ;;  %v505_v20 = vld [vmem:[%s2990_s5 + $0x28] sm:$0xff] }
 0x15a   :  { %751 = vmatpush.msrb.mxu0 %v673_v19  ;;  %v710_v19 = vld [vmem:[#allocation5 + $0x1f8] sm:$0xff] }
 0x161   :  { %427 = vmatmul.f32.gmra.mxu2 %v397_v21  ;;  %476 = vmatmul.f32.gmra.mxu3 %v446_v22  ;;  %v577_v21 = vld [vmem:[#allocation2 + $0x18] sm:$0xff]  ;;  %v671_v22 = vld [vmem:[#allocation5 + $0xc0] sm:$0xff] }
 0x162   :  { %752 = vmatpush.msrb.mxu0 %v671_v22  ;;  %v736_v22 = vld [vmem:[#allocation5 + $0x2c8] sm:$0xff] }
 0x164   :  { %753 = vmatpush.msrb.mxu0 %v669_v24  ;;  %v734_v24 = vld [vmem:[#allocation5 + $0x2b8] sm:$0xff] }
 0x166   :  { %754 = vmatpush.msrb.mxu0 %v667_v26 }
 0x169   :  { %430 = vmatmul.f32.gmra.mxu2 %v398_v27  ;;  %479 = vmatmul.f32.gmra.mxu3 %v447_v48  ;;  %v580_v27 = vld [vmem:[#allocation2 + $0x30] sm:$0xff] }
 0x16a   :  { %v665_v48 = vld [vmem:[#allocation5 + $0x90] sm:$0xff] }
 0x16b   :  { %755 = vmatpush.msrb.mxu0 %v665_v48  ;;  %v732_v48 = vld [vmem:[#allocation5 + $0x2a8] sm:$0xff] }
 0x171   :  { %433 = vmatmul.f32.gmra.mxu2 %v399_v52  ;;  %482 = vmatmul.f32.gmra.mxu3 %v448_v47  ;;  %v663_v52 = vld [vmem:[#allocation5 + $0x80] sm:$0xff]  ;;  %v672_v47 = vld [vmem:[#allocation5 + $0xc8] sm:$0xff] }
 0x172   :  { %756 = vmatpush.msrb.mxu0 %v663_v52  ;;  %v698_v52 = vld [vmem:[#allocation5 + $0x198] sm:$0xff] }
 0x174   :  { %757 = vmatpush.msrb.mxu0 %v661_v45  ;;  %v724_v45 = vld [vmem:[#allocation5 + $0x268] sm:$0xff] }
 0x176   :  { %758 = vmatpush.msrb.mxu0 %v659_v42  ;;  %v692_v42 = vld [vmem:[#allocation5 + $0x168] sm:$0xff] }
 0x179   :  { %436 = vmatmul.f32.gmra.mxu2 %v400_v55  ;;  %485 = vmatmul.f32.gmra.mxu3 %v449_v56  ;;  %v741_v55 = vld [vmem:[#allocation5 + $0x2f0] sm:$0xff]  ;;  %v664_v56 = vld [vmem:[#allocation5 + $0x88] sm:$0xff] }
 0x181   :  { %439 = vmatmul.f32.gmra.mxu2 %v401_v57  ;;  %488 = vmatmul.f32.gmra.mxu3 %v450_v58  ;;  %v657_v57 = vld [vmem:[#allocation5 + $0x50] sm:$0xff] }
 0x182   :  { %v737_v58 = vld [vmem:[#allocation5 + $0x2d0] sm:$0xff]  ;;  %759 = vmatpush.msrb.mxu0 %v657_v57  ;;  %v690_v57 = vld [vmem:[#allocation5 + $0x158] sm:$0xff] }
 0x184   :  { %760 = vmatpush.msrb.mxu0 %v655_v40 }
 0x1cc   :  { %v419_v41 = vpop.f32.mrf.mxu2  ;;  %v468_v62 = vpop.f32.mrf.mxu3 }
 0x1cd   :  { %v2538_v63 = vmax.f32 %v419_v41, %v468_v62  ;;  %v735_v41 = vld [vmem:[#allocation5 + $0x2c0] sm:$0xff]  ;;  %v660_v62 = vld [vmem:[#allocation5 + $0x68] sm:$0xff] }
 0x1cf   :  { %806 = vmatmul.f32.vlgmr.msrb.gmra.mxu1 %v2538_v63 }
 0x1d4   :  { %v422_v0 = vpop.f32.mrf.mxu2  ;;  %v471_v38 = vpop.f32.mrf.mxu3 }
 0x1d5   :  { %v2541_v39 = vmax.f32 %v422_v0, %v471_v38  ;;  %v653_v0 = vld [vmem:[#allocation5 + $0x30] sm:$0xff] }
 0x1d6   :  { %v733_v38 = vld [vmem:[#allocation5 + $0x2b0] sm:$0xff]  ;;  %761 = vmatpush.msrb.mxu0 %v653_v0  ;;  %v686_v0 = vld [vmem:[#allocation5 + $0x138] sm:$0xff] }
 0x1d7   :  { %809 = vmatmul.f32.gmra.mxu1 %v2541_v39 }
 0x1dc   :  { %v425_v1 = vpop.f32.mrf.mxu2  ;;  %v474_v2 = vpop.f32.mrf.mxu3 }
 0x1dd   :  { %v2544_v3 = vmax.f32 %v425_v1, %v474_v2  ;;  %v658_v1 = vld [vmem:[#allocation5 + $0x58] sm:$0xff]  ;;  %v651_v2 = vld [vmem:[#allocation5 + $0x20] sm:$0xff] }
 0x1de   :  { %762 = vmatpush.msrb.mxu0 %v651_v2  ;;  %v712_v2 = vld [vmem:[#allocation5 + $0x208] sm:$0xff] }
 0x1df   :  { %812 = vmatmul.f32.gmra.mxu1 %v2544_v3 }
 0x1e4   :  { %v428_v36 = vpop.f32.mrf.mxu2  ;;  %v477_v37 = vpop.f32.mrf.mxu3 }
 0x1e5   :  { %v2547_v4 = vmax.f32 %v428_v36, %v477_v37  ;;  %v731_v36 = vld [vmem:[#allocation5 + $0x2a0] sm:$0xff]  ;;  %v656_v37 = vld [vmem:[#allocation5 + $0x48] sm:$0xff] }
 0x1e7   :  { %815 = vmatmul.f32.gmra.mxu1 %v2547_v4 }
 0x1ec   :  { %v431_v5 = vpop.f32.mrf.mxu2  ;;  %v480_v6 = vpop.f32.mrf.mxu3 }
 0x1ed   :  { %v2550_v34 = vmax.f32 %v431_v5, %v480_v6  ;;  %v649_v5 = vld [vmem:[#allocation5 + $0x10] sm:$0xff] }
 0x1ee   :  { %v729_v6 = vld [vmem:[#allocation5 + $0x290] sm:$0xff]  ;;  %763 = vmatpush.msrb.mxu0 %v649_v5  ;;  %v682_v5 = vld [vmem:[#allocation5 + $0x118] sm:$0xff] }
 0x1ef   :  { %818 = vmatmul.f32.gmra.mxu1 %v2550_v34 }
 0x1f4   :  { %v434_v35 = vpop.f32.mrf.mxu2  ;;  %v483_v7 = vpop.f32.mrf.mxu3 }
 0x1f5   :  { %v2553_v8 = vmax.f32 %v434_v35, %v483_v7  ;;  %v654_v35 = vld [vmem:[#allocation5 + $0x38] sm:$0xff]  ;;  %v652_v7 = vld [vmem:[#allocation5 + $0x28] sm:$0xff] }
 0x1f7   :  { %821 = vmatmul.f32.gmra.mxu1 %v2553_v8 }
 0x1fc   :  { %v437_v9 = vpop.f32.mrf.mxu2  ;;  %v486_v32 = vpop.f32.mrf.mxu3 }
 0x1fd   :  { %v2556_v33 = vmax.f32 %v437_v9, %v486_v32  ;;  %v650_v9 = vld [vmem:[#allocation5 + $0x18] sm:$0xff]  ;;  %v647_v32 = vld [vmem:[#allocation5] sm:$0xff] }
 0x1fe   :  { %764 = vmatpush.msrb.mxu0 %v647_v32 }
 0x1ff   :  { %824 = vmatmul.f32.gmra.mxu1 %v2556_v33 }
 0x200   :  { %913 = vmatpush.msra.mxu0 %v710_v19 }
 0x204   :  { %v440_v10 = vpop.f32.mrf.mxu2  ;;  %v489_v11 = vpop.f32.mrf.mxu3 }
 0x205   :  { %v2559_v12 = vmax.f32 %v440_v10, %v489_v11  ;;  %v727_v10 = vld [vmem:[#allocation5 + $0x280] sm:$0xff]  ;;  %v648_v11 = vld [vmem:[#allocation5 + $0x8] sm:$0xff] }
 0x207   :  { %541 = vmatpush.msrb.mxu2 %v2559_v12  ;;  %1974 = vmatpush.msrb.mxu3 %v2559_v12 }
 0x208   :  { %827 = vmatmul.f32.gmra.mxu1 %v2559_v12 }
 0x209   :  { %542 = vmatpush.msrb.mxu2 %v2556_v33  ;;  %1975 = vmatpush.msrb.mxu3 %v2556_v33 }
 0x20b   :  { %543 = vmatpush.msrb.mxu2 %v2553_v8  ;;  %1976 = vmatpush.msrb.mxu3 %v2553_v8 }
 0x20d   :  { %544 = vmatpush.msrb.mxu2 %v2550_v34  ;;  %1977 = vmatpush.msrb.mxu3 %v2550_v34 }
 0x20f   :  { %545 = vmatpush.msrb.mxu2 %v2547_v4  ;;  %1978 = vmatpush.msrb.mxu3 %v2547_v4 }
 0x211   :  { %546 = vmatpush.msrb.mxu2 %v2544_v3  ;;  %1979 = vmatpush.msrb.mxu3 %v2544_v3 }
 0x213   :  { %547 = vmatpush.msrb.mxu2 %v2541_v39  ;;  %1980 = vmatpush.msrb.mxu3 %v2541_v39 }
 0x215   :  { %548 = vmatpush.msrb.mxu2 %v2538_v63  ;;  %1981 = vmatpush.msrb.mxu3 %v2538_v63 }
 0x216   :  { %1950 = vmatmul.msk.f32.vlgmr.msrb.gmra.mxu2 %vm508_vm1, %v500_v30  ;;  %1956 = vmatmul.msk.f32.vlgmr.msrb.gmra.mxu3 %vm508_vm1, %v506_v13  ;;  %v725_v30 = vld [vmem:[#allocation5 + $0x270] sm:$0xff]  ;;  %v723_v13 = vld [vmem:[#allocation5 + $0x260] sm:$0xff] }
 0x217   :  { %614 = vmatpush.msra.mxu3 %v2559_v12  ;;  %831 = vmatpush.msra.mxu2 %v741_v55  ;;  %v694_v55 = vld [vmem:[#allocation5 + $0x178] sm:$0xff] }
 0x219   :  { %615 = vmatpush.msra.mxu3 %v2556_v33  ;;  %832 = vmatpush.msra.mxu2 %v739_v43  ;;  %v720_v43 = vld [vmem:[#allocation5 + $0x248] sm:$0xff] }
 0x21b   :  { %616 = vmatpush.msra.mxu3 %v2553_v8  ;;  %833 = vmatpush.msra.mxu2 %v737_v58  ;;  %v718_v58 = vld [vmem:[#allocation5 + $0x238] sm:$0xff] }
 0x21d   :  { %617 = vmatpush.msra.mxu3 %v2550_v34  ;;  %834 = vmatpush.msra.mxu2 %v735_v41  ;;  %v688_v41 = vld [vmem:[#allocation5 + $0x148] sm:$0xff] }
 0x21e   :  { %1951 = vmatmul.msk.f32.gmra.mxu2 %vm508_vm1, %v501_v31  ;;  %1957 = vmatmul.msk.f32.gmra.mxu3 %vm508_vm1, %v507_v14  ;;  %v721_v31 = vld [vmem:[#allocation5 + $0x250] sm:$0xff]  ;;  %v719_v14 = vld [vmem:[#allocation5 + $0x240] sm:$0xff] }
 0x21f   :  { %618 = vmatpush.msra.mxu3 %v2547_v4  ;;  %835 = vmatpush.msra.mxu2 %v733_v38  ;;  %v714_v38 = vld [vmem:[#allocation5 + $0x218] sm:$0xff] }
 0x221   :  { %619 = vmatpush.msra.mxu3 %v2544_v3  ;;  %836 = vmatpush.msra.mxu2 %v731_v36 }
 0x223   :  { %620 = vmatpush.msra.mxu3 %v2541_v39  ;;  %837 = vmatpush.msra.mxu2 %v729_v6  ;;  %v680_v6 = vld [vmem:[#allocation5 + $0x108] sm:$0xff] }
 0x225   :  { %621 = vmatpush.msra.mxu3 %v2538_v63  ;;  %838 = vmatpush.msra.mxu2 %v727_v10 }
 0x226   :  { %1952 = vmatmul.msk.f32.gmra.mxu2 %vm508_vm1, %v502_v15  ;;  %1958 = vmatmul.msk.f32.vlgmr.msra.gmra.mxu3 %vm508_vm1, %v574_v16  ;;  %v717_v15 = vld [vmem:[#allocation5 + $0x230] sm:$0xff]  ;;  %v715_v16 = vld [vmem:[#allocation5 + $0x220] sm:$0xff] }
 0x227   :  { %872 = vmatpush.msrb.mxu3 %v678_v49  ;;  %839 = vmatpush.msra.mxu2 %v725_v30  ;;  %v702_v49 = vld [vmem:[#allocation5 + $0x1b8] sm:$0xff] }
 0x229   :  { %873 = vmatpush.msrb.mxu3 %v676_v51  ;;  %840 = vmatpush.msra.mxu2 %v723_v13  ;;  %v700_v51 = vld [vmem:[#allocation5 + $0x1a8] sm:$0xff] }
 0x22b   :  { %874 = vmatpush.msrb.mxu3 %v674_v46  ;;  %841 = vmatpush.msra.mxu2 %v721_v31  ;;  %v728_v46 = vld [vmem:[#allocation5 + $0x288] sm:$0xff] }
 0x22d   :  { %875 = vmatpush.msrb.mxu3 %v672_v47  ;;  %842 = vmatpush.msra.mxu2 %v719_v14  ;;  %v726_v47 = vld [vmem:[#allocation5 + $0x278] sm:$0xff] }
 0x22e   :  { %1953 = vmatmul.msk.f32.gmra.mxu2 %vm508_vm1, %v503_v29  ;;  %1959 = vmatmul.msk.f32.gmra.mxu3 %vm508_vm1, %v575_v59  ;;  %v711_v29 = vld [vmem:[#allocation5 + $0x200] sm:$0xff]  ;;  %v742_v59 = vld [vmem:[#allocation5 + $0x2f8] sm:$0xff] }
 0x22f   :  { %876 = vmatpush.msrb.mxu3 %v670_v53  ;;  %843 = vmatpush.msra.mxu2 %v717_v15 }
 0x230   :  { %954 = vmatpush.msra.mxu1 %v742_v59 }
 0x231   :  { %877 = vmatpush.msrb.mxu3 %v668_v54  ;;  %844 = vmatpush.msra.mxu2 %v715_v16 }
 0x233   :  { %878 = vmatpush.msrb.mxu3 %v666_v44  ;;  %845 = vmatpush.msra.mxu2 %v713_v28  ;;  %v696_v44 = vld [vmem:[#allocation5 + $0x188] sm:$0xff] }
 0x235   :  { %879 = vmatpush.msrb.mxu3 %v664_v56  ;;  %846 = vmatpush.msra.mxu2 %v711_v29  ;;  %v722_v56 = vld [vmem:[#allocation5 + $0x258] sm:$0xff] }
 0x236   :  { %1954 = vmatmul.msk.f32.gmra.mxu2 %vm508_vm1, %v504_v17  ;;  %1960 = vmatmul.msk.f32.gmra.mxu3 %vm508_vm1, %v576_v18  ;;  %v740_v18 = vld [vmem:[#allocation5 + $0x2e8] sm:$0xff] }
 0x237   :  { %880 = vmatpush.msrb.mxu3 %v662_v61  ;;  %955 = vmatpush.msra.mxu1 %v740_v18 }
 0x239   :  { %881 = vmatpush.msrb.mxu3 %v660_v62  ;;  %v716_v62 = vld [vmem:[#allocation5 + $0x228] sm:$0xff] }
 0x23b   :  { %882 = vmatpush.msrb.mxu3 %v658_v1  ;;  %v684_v1 = vld [vmem:[#allocation5 + $0x128] sm:$0xff] }
 0x23d   :  { %883 = vmatpush.msrb.mxu3 %v656_v37 }
 0x23e   :  { %1955 = vmatmul.msk.f32.gmra.mxu2 %vm508_vm1, %v505_v20  ;;  %1961 = vmatmul.msk.f32.gmra.mxu3 %vm508_vm1, %v577_v21  ;;  %v738_v20 = vld [vmem:[#allocation5 + $0x2d8] sm:$0xff]  ;;  %v708_v21 = vld [vmem:[#allocation5 + $0x1e8] sm:$0xff] }
 0x23f   :  { %884 = vmatpush.msrb.mxu3 %v654_v35  ;;  %956 = vmatpush.msra.mxu1 %v738_v20 }
 0x240   :  { %914 = vmatpush.msra.mxu0 %v708_v21 }
 0x241   :  { %885 = vmatpush.msrb.mxu3 %v652_v7  ;;  %957 = vmatpush.msra.mxu1 %v736_v22 }
 0x243   :  { %886 = vmatpush.msrb.mxu3 %v650_v9  ;;  %958 = vmatpush.msra.mxu1 %v734_v24 }
 0x245   :  { %887 = vmatpush.msrb.mxu3 %v648_v11  ;;  %959 = vmatpush.msra.mxu1 %v732_v48 }
 0x246   :  { %1962 = vmatmul.msk.f32.gmra.mxu3 %vm508_vm1, %v578_v23  ;;  %v706_v23 = vld [vmem:[#allocation5 + $0x1d8] sm:$0xff] }
 0x247   :  { %915 = vmatpush.msra.mxu0 %v706_v23 }
 0x24c   :  { %v807_v30 = vpop.f32.mrf.mxu1 }
 0x24e   :  { %1963 = vmatmul.msk.f32.gmra.mxu3 %vm508_vm1, %v579_v25 }
 0x254   :  { %v2640_v13 = vpop.f32.mrf.mxu1 }
 0x256   :  { %1964 = vmatmul.msk.f32.gmra.mxu3 %vm508_vm1, %v580_v27  ;;  %v704_v27 = vld [vmem:[#allocation5 + $0x1c8] sm:$0xff] }
 0x257   :  { %916 = vmatpush.msra.mxu0 %v704_v27 }
 0x259   :  { %917 = vmatpush.msra.mxu0 %v702_v49 }
 0x25b   :  { %918 = vmatpush.msra.mxu0 %v700_v51 }
 0x25d   :  { %919 = vmatpush.msra.mxu0 %v698_v52 }
 0x25e   :  { %1965 = vmatmul.msk.f32.gmra.mxu3 %vm508_vm1, %v581_v50  ;;  %v730_v50 = vld [vmem:[#allocation5 + $0x298] sm:$0xff] }
 0x25f   :  { %960 = vmatpush.msra.mxu1 %v730_v50  ;;  %920 = vmatpush.msra.mxu0 %v696_v44 }
 0x261   :  { %961 = vmatpush.msra.mxu1 %v728_v46  ;;  %921 = vmatpush.msra.mxu0 %v694_v55 }
 0x263   :  { %962 = vmatpush.msra.mxu1 %v726_v47  ;;  %922 = vmatpush.msra.mxu0 %v692_v42 }
 0x265   :  { %963 = vmatpush.msra.mxu1 %v724_v45  ;;  %923 = vmatpush.msra.mxu0 %v690_v57 }
 0x267   :  { %964 = vmatpush.msra.mxu1 %v722_v56  ;;  %924 = vmatpush.msra.mxu0 %v688_v41 }
 0x269   :  { %965 = vmatpush.msra.mxu1 %v720_v43  ;;  %925 = vmatpush.msra.mxu0 %v686_v0 }
 0x26b   :  { %966 = vmatpush.msra.mxu1 %v718_v58  ;;  %926 = vmatpush.msra.mxu0 %v684_v1 }
 0x26d   :  { %967 = vmatpush.msra.mxu1 %v716_v62  ;;  %927 = vmatpush.msra.mxu0 %v682_v5 }
 0x26f   :  { %968 = vmatpush.msra.mxu1 %v714_v38  ;;  %928 = vmatpush.msra.mxu0 %v680_v6 }
 0x271   :  { %969 = vmatpush.msra.mxu1 %v712_v2 }
 0x299   :  { %v550_v60 = vpop.f32.mrf.mxu2  ;;  %v2626_v17 = vpop.f32.mrf.mxu3 }
 0x29a   :  { %765 = vmatmul.f32.vlgmr.msrb.gmra.mxu0 %v550_v60  ;;  %888 = vmatmul.f32.vlgmr.msrb.gmra.mxu3 %v550_v60 }
 0x2a1   :  { %v553_v25 = vpop.f32.mrf.mxu2  ;;  %v2628_v26 = vpop.f32.mrf.mxu3 }
 0x2a2   :  { %768 = vmatmul.f32.gmra.mxu0 %v553_v25  ;;  %891 = vmatmul.f32.gmra.mxu3 %v553_v25 }
 0x2a9   :  { %v556_v53 = vpop.f32.mrf.mxu2  ;;  %v623_v54 = vpop.f32.mrf.mxu3 }
 0x2aa   :  { %771 = vmatmul.f32.gmra.mxu0 %v556_v53  ;;  %847 = vmatmul.f32.vlgmr.msra.gmra.mxu2 %v623_v54 }
 0x2ab   :  { %894 = vmatmul.f32.gmra.mxu3 %v556_v53  ;;  %970 = vmatmul.f32.vlgmr.msra.gmra.mxu1 %v623_v54 }
 0x2b1   :  { %v559_v61 = vpop.f32.mrf.mxu2  ;;  %v626_v40 = vpop.f32.mrf.mxu3 }
 0x2b2   :  { %774 = vmatmul.f32.gmra.mxu0 %v559_v61  ;;  %850 = vmatmul.f32.gmra.mxu2 %v626_v40 }
 0x2b3   :  { %897 = vmatmul.f32.gmra.mxu3 %v559_v61  ;;  %973 = vmatmul.f32.gmra.mxu1 %v626_v40 }
 0x2b9   :  { %v562_v36 = vpop.f32.mrf.mxu2  ;;  %v629_v37 = vpop.f32.mrf.mxu3 }
 0x2ba   :  { %777 = vmatmul.f32.gmra.mxu0 %v562_v36  ;;  %853 = vmatmul.f32.gmra.mxu2 %v629_v37 }
 0x2bb   :  { %900 = vmatmul.f32.gmra.mxu3 %v562_v36  ;;  %976 = vmatmul.f32.gmra.mxu1 %v629_v37 }
 0x2c1   :  { %v565_v35 = vpop.f32.mrf.mxu2  ;;  %v632_v7 = vpop.f32.mrf.mxu3 }
 0x2c2   :  { %780 = vmatmul.f32.gmra.mxu0 %v565_v35  ;;  %856 = vmatmul.f32.gmra.mxu2 %v632_v7 }
 0x2c3   :  { %903 = vmatmul.f32.gmra.mxu3 %v565_v35  ;;  %979 = vmatmul.f32.gmra.mxu1 %v632_v7 }
 0x2c9   :  { %v635_v9 = vpop.f32.mrf.mxu3 }
 0x2ca   :  { %783 = vmatmul.f32.gmra.mxu0 %v2626_v17  ;;  %859 = vmatmul.f32.gmra.mxu2 %v635_v9 }
 0x2cb   :  { %906 = vmatmul.f32.gmra.mxu3 %v2626_v17  ;;  %982 = vmatmul.f32.gmra.mxu1 %v635_v9 }
 0x2d1   :  { %v638_v32 = vpop.f32.mrf.mxu3 }
 0x2d2   :  { %786 = vmatmul.f32.gmra.mxu0 %v2628_v26  ;;  %862 = vmatmul.f32.gmra.mxu2 %v638_v32 }
 0x2d3   :  { %909 = vmatmul.f32.gmra.mxu3 %v2628_v26  ;;  %985 = vmatmul.f32.gmra.mxu1 %v638_v32 }
 0x2d9   :  { %v641_v10 = vpop.f32.mrf.mxu3 }
 0x2da   :  { %865 = vmatmul.f32.gmra.mxu2 %v641_v10  ;;  %929 = vmatmul.f32.vlgmr.msra.gmra.mxu0 %v2538_v63  ;;  %v2643_v63 = vpop.f32.mrf.mxu1 }
 0x2db   :  { %988 = vmatmul.f32.gmra.mxu1 %v641_v10 }
 0x2e1   :  { %v644_v11 = vpop.f32.mrf.mxu3 }
 0x2e2   :  { %868 = vmatmul.f32.gmra.mxu2 %v644_v11  ;;  %932 = vmatmul.f32.gmra.mxu0 %v2541_v39  ;;  %v2646_v31 = vpop.f32.mrf.mxu1 }
 0x2e3   :  { %991 = vmatmul.f32.gmra.mxu1 %v644_v11 }
 0x2ea   :  { %935 = vmatmul.f32.gmra.mxu0 %v2544_v3 }
 0x2f2   :  { %938 = vmatmul.f32.gmra.mxu0 %v2547_v4  ;;  %v743_v4 = vld [vmem:[%s2993_s8] sm:$0x3] }
 0x2f3   :  { %v746_v25 = vperm.slane %v743_v4, 1 }
 0x2fa   :  { %941 = vmatmul.f32.gmra.mxu0 %v2550_v34  ;;  %v2653_v34 = vperm.slane %v743_v4, 0 }
 0x302   :  { %944 = vmatmul.f32.gmra.mxu0 %v2553_v8  ;;  %v2655_v8 = vpop.f32.mrf.mxu1 }
 0x30a   :  { %947 = vmatmul.f32.gmra.mxu0 %v2556_v33  ;;  %v2660_v28 = vpop.f32.mrf.mxu1 }
 0x312   :  { %950 = vmatmul.f32.gmra.mxu0 %v2559_v12  ;;  %v825_v60 = vpop.f32.mrf.mxu1 }
 0x317   :  { %v766_v39 = vpop.f32.mrf.mxu0 }
 0x318   :  { %v767_v33 = vadd.f32 %v766_v39, %v2653_v34 }
 0x31a   :  { %v808_v15 = vadd.f32 %v807_v30, %v767_v33  ;;  %v828_v18 = vpop.f32.mrf.mxu1 }
 0x31d   :  { %v889_v19 = vpop.f32.mrf.mxu3 }
 0x31e   :  { %v890_v27 = vadd.f32 %v889_v19, %v746_v25 }
 0x31f   :  { %v2648_v3 = vpop.f32.mrf.mxu0 }
 0x325   :  { %v892_v22 = vpop.f32.mrf.mxu3 }
 0x327   :  { %v2657_v14 = vpop.f32.mrf.mxu0 }
 0x328   :  { %v971_v21 = vpop.f32.mrf.mxu1 }
 0x32d   :  { %v848_v16 = vpop.f32.mrf.mxu2 }
 0x32e   :  { %v849_v12 = vadd.f32 %v848_v16, %v808_v15  ;;  %v895_v50 = vpop.f32.mrf.mxu3 }
 0x32f   :  { %v775_v29 = vpop.f32.mrf.mxu0 }
 0x330   :  { %v2664_v26 = vpop.f32.mrf.mxu1  ;;  %v995_v52 = vmax.f32 %v849_v12, 0.0 }
 0x335   :  { %v2662_v24 = vpop.f32.mrf.mxu2 }
 0x336   :  { %v898_v45 = vpop.f32.mrf.mxu3 }
 0x337   :  { %v778_v59 = vpop.f32.mrf.mxu0 }
 0x338   :  { %v2670_v44 = vpop.f32.mrf.mxu1  ;;  %v779_v15 = vadd.f32 %v778_v59, %v2653_v34  ;;  %v773_v59 = vadd.f32 %v2657_v14, %v2653_v34 }
 0x33a   :  { %v814_v14 = vadd.f32 %v2643_v63, %v773_v59  ;;  %v1349_v59 = vld [vmem:[#allocation8 + $0x760] sm:$0xff] }
 0x33d   :  { %v2666_v51 = vpop.f32.mrf.mxu2 }
 0x33e   :  { %v901_v43 = vpop.f32.mrf.mxu3 }
 0x33f   :  { %v781_v17 = vpop.f32.mrf.mxu0  ;;  %v902_v39 = vadd.f32 %v901_v43, %v746_v25 }
 0x340   :  { %v980_v42 = vpop.f32.mrf.mxu1  ;;  %v782_v11 = vadd.f32 %v781_v17, %v2653_v34 }
 0x345   :  { %v857_v55 = vpop.f32.mrf.mxu2 }
 0x346   :  { %v904_v40 = vpop.f32.mrf.mxu3 }
 0x347   :  { %v784_v20 = vpop.f32.mrf.mxu0  ;;  %v905_v9 = vadd.f32 %v904_v40, %v746_v25 }
 0x348   :  { %v983_v61 = vpop.f32.mrf.mxu1  ;;  %v785_v35 = vadd.f32 %v784_v20, %v2653_v34  ;;  %v893_v20 = vadd.f32 %v892_v22, %v746_v25 }
 0x34a   :  { %v826_v16 = vadd.f32 %v825_v60, %v785_v35  ;;  %v820_v60 = vadd.f32 %v2655_v8, %v779_v15  ;;  %v1293_v15 = vld [vmem:[#allocation8 + $0x5a0] sm:$0xff] }
 0x34d   :  { %v860_v57 = vpop.f32.mrf.mxu2 }
 0x34e   :  { %v907_v1 = vpop.f32.mrf.mxu3 }
 0x34f   :  { %v787_v23 = vpop.f32.mrf.mxu0  ;;  %v908_v6 = vadd.f32 %v907_v1, %v746_v25 }
 0x350   :  { %v986_v0 = vpop.f32.mrf.mxu1  ;;  %v788_v5 = vadd.f32 %v787_v23, %v2653_v34 }
 0x352   :  { %v829_v30 = vadd.f32 %v828_v18, %v788_v5  ;;  %v896_v18 = vadd.f32 %v895_v50, %v746_v25 }
 0x355   :  { %v863_v62 = vpop.f32.mrf.mxu2 }
 0x356   :  { %v910_v7 = vpop.f32.mrf.mxu3 }
 0x357   :  { %v930_v48 = vpop.f32.mrf.mxu0  ;;  %v911_v4 = vadd.f32 %v910_v7, %v746_v25 }
 0x358   :  { %v931_v49 = vadd.f32 %v930_v48, %v890_v27  ;;  %v989_v36 = vpop.f32.mrf.mxu1 }
 0x35a   :  { %v972_v46 = vadd.f32 %v971_v21, %v931_v49  ;;  %v899_v21 = vadd.f32 %v898_v45, %v746_v25  ;;  %v776_v49 = vadd.f32 %v775_v29, %v2653_v34  ;;  %v861_v25 = vadd.f32 %v860_v57, %v820_v60  ;;  %v1149_v60 = vld [vmem:[#allocation8 + $0x120] sm:$0xff] }
 0x35c   :  { %v996_v47 = vmax.f32 %v972_v46, 0.0  ;;  %v823_v46 = vadd.f32 %v2660_v28, %v782_v11  ;;  %v770_v28 = vadd.f32 %v2648_v3, %v2653_v34  ;;  %v817_v29 = vadd.f32 %v2646_v31, %v776_v49  ;;  %v1173_v11 = vld [vmem:[#allocation8 + $0x1e0] sm:$0xff]  ;;  %v1065_v49 = vld [vmem:[#allocation7 + $0x8] sm:$0xff] }
 0x35d   :  { %v866_v2 = vpop.f32.mrf.mxu2  ;;  %v855_v31 = vadd.f32 %v2666_v51, %v814_v14  ;;  %v1003_v34 = vmax.f32 %v861_v25, 0.0  ;;  %v1205_v25 = vld [vmem:[#allocation8 + $0x2e0] sm:$0xff] }
 0x35e   :  { %v2668_v53 = vmax.f32 %v995_v52, %v996_v47  ;;  %v867_v52 = vadd.f32 %v866_v2, %v826_v16  ;;  %v864_v45 = vadd.f32 %v863_v62, %v823_v46  ;;  %v858_v8 = vadd.f32 %v857_v55, %v817_v29  ;;  %v1365_v16 = vld [vmem:[#allocation8 + $0x7e0] sm:$0xff] }
 0x35f   :  { %v933_v54 = vpop.f32.mrf.mxu0  ;;  %v811_v3 = vadd.f32 %v2640_v13, %v770_v28  ;;  %v999_v35 = vmax.f32 %v855_v31, 0.0  ;;  %1429 = vmatpush.msrb.mxu1 %v1365_v16  ;;  %v1157_v46 = vld [vmem:[#allocation8 + $0x160] sm:$0xff]  ;;  %v1066_v28 = vld [vmem:[#allocation7 + $0x10] sm:$0xff]  ;;  %v1022_v31 = vld [vmem:[%s2994_s9 + $0x18] sm:$0xff] }
 0x360   :  { %v992_v17 = vpop.f32.mrf.mxu1  ;;  %v1007_v50 = vmax.f32 %v867_v52, 0.0  ;;  %v1005_v62 = vmax.f32 %v864_v45, 0.0  ;;  %v1001_v55 = vmax.f32 %v858_v8, 0.0  ;;  %v1221_v52 = vld [vmem:[#allocation8 + $0x360] sm:$0xff]  ;;  %v1166_v16 = vld [vmem:[#allocation8 + $0x1a8] sm:$0xff] }
 0x361   :  { %v852_v63 = vadd.f32 %v2662_v24, %v811_v3  ;;  %v1019_v24 = vld [vmem:[%s2994_s9] sm:$0xff] }
 0x362   :  { %v1213_v45 = vld [vmem:[#allocation8 + $0x320] sm:$0xff] }
 0x363   :  { %v997_v51 = vmax.f32 %v852_v63, 0.0  ;;  %v1141_v29 = vld [vmem:[#allocation8 + $0xe0] sm:$0xff] }
 0x364   :  { %v1337_v14 = vld [vmem:[#allocation8 + $0x700] sm:$0xff] }
 0x365   :  { %v869_v32 = vpop.f32.mrf.mxu2  ;;  %v1133_v8 = vld [vmem:[#allocation8 + $0xa0] sm:$0xff] }
 0x366   :  { %v870_v12 = vadd.f32 %v869_v32, %v829_v30  ;;  %v1064_v32 = vld [vmem:[#allocation7] sm:$0xff] }
 0x367   :  { %v936_v56 = vpop.f32.mrf.mxu0  ;;  %v1237_v30 = vld [vmem:[#allocation8 + $0x3e0] sm:$0xff] }
 0x368   :  { %v1193_v3 = vld [vmem:[#allocation8 + $0x280] sm:$0xff] }
 0x369   :  { %v1329_v63 = vld [vmem:[#allocation8 + $0x6c0] sm:$0xff] }
 0x36f   :  { %v939_v58 = vpop.f32.mrf.mxu0 }
 0x370   :  { %v940_v47 = vadd.f32 %v939_v58, %v899_v21  ;;  %v934_v58 = vadd.f32 %v933_v54, %v893_v20  ;;  %v1361_v21 = vld [vmem:[#allocation8 + $0x7c0] sm:$0xff]  ;;  %v1020_v20 = vld [vmem:[%s2994_s9 + $0x8] sm:$0xff] }
 0x371   :  { %1430 = vmatpush.msrb.mxu1 %v1361_v21  ;;  %v1309_v21 = vld [vmem:[#allocation8 + $0x620] sm:$0xff] }
 0x372   :  { %v975_v54 = vadd.f32 %v2664_v26, %v934_v58  ;;  %v1341_v58 = vld [vmem:[#allocation8 + $0x720] sm:$0xff] }
 0x374   :  { %v998_v7 = vmax.f32 %v975_v54, 0.0  ;;  %v1125_v54 = vld [vmem:[#allocation8 + $0x60] sm:$0xff] }
 0x377   :  { %v942_v41 = vpop.f32.mrf.mxu0 }
 0x378   :  { %v943_v23 = vadd.f32 %v942_v41, %v902_v39  ;;  %v1009_v41 = vmax.f32 %v870_v12, 0.0  ;;  %v1297_v39 = vld [vmem:[#allocation8 + $0x5c0] sm:$0xff] }
 0x379   :  { %v1165_v12 = vld [vmem:[#allocation8 + $0x1a0] sm:$0xff] }
 0x37a   :  { %v984_v1 = vadd.f32 %v983_v61, %v943_v23  ;;  %v1289_v23 = vld [vmem:[#allocation8 + $0x580] sm:$0xff] }
 0x37c   :  { %v1004_v61 = vmax.f32 %v984_v1, 0.0  ;;  %v1145_v1 = vld [vmem:[#allocation8 + $0x100] sm:$0xff] }
 0x37f   :  { %v945_v38 = vpop.f32.mrf.mxu0 }
 0x380   :  { %v946_v33 = vadd.f32 %v945_v38, %v905_v9  ;;  %v937_v38 = vadd.f32 %v936_v56, %v896_v18  ;;  %v1012_v9 = vmax.f32 %v997_v51, %v998_v7  ;;  %v1353_v18 = vld [vmem:[#allocation8 + $0x780] sm:$0xff] }
 0x381   :  { %v1117_v7 = vld [vmem:[#allocation8 + $0x20] sm:$0xff] }
 0x382   :  { %v987_v43 = vadd.f32 %v986_v0, %v946_v33  ;;  %v981_v0 = vadd.f32 %v980_v42, %v940_v47  ;;  %v978_v56 = vadd.f32 %v2670_v44, %v937_v38  ;;  %v1015_v44 = vmax.f32 %v1003_v34, %v1004_v61  ;;  %v1233_v33 = vld [vmem:[#allocation8 + $0x3c0] sm:$0xff]  ;;  %v1067_v34 = vld [vmem:[#allocation7 + $0x18] sm:$0xff] }
 0x383   :  { %v1153_v47 = vld [vmem:[#allocation8 + $0x140] sm:$0xff] }
 0x384   :  { %v1006_v2 = vmax.f32 %v987_v43, 0.0  ;;  %v1002_v42 = vmax.f32 %v981_v0, 0.0  ;;  %v1217_v43 = vld [vmem:[#allocation8 + $0x340] sm:$0xff] }
 0x385   :  { %v1345_v38 = vld [vmem:[#allocation8 + $0x740] sm:$0xff] }
 0x386   :  { %v1016_v57 = vmax.f32 %v1005_v62, %v1006_v2  ;;  %v1014_v13 = vmax.f32 %v1001_v55, %v1002_v42  ;;  %v1137_v0 = vld [vmem:[#allocation8 + $0xc0] sm:$0xff] }
 0x387   :  { %v948_v37 = vpop.f32.mrf.mxu0  ;;  %v1201_v2 = vld [vmem:[#allocation8 + $0x2c0] sm:$0xff] }
 0x388   :  { %v949_v10 = vadd.f32 %v948_v37, %v908_v6  ;;  %v1000_v6 = vmax.f32 %v978_v56, 0.0  ;;  %v1197_v62 = vld [vmem:[#allocation8 + $0x2a0] sm:$0xff] }
 0x389   :  { %v1265_v56 = vld [vmem:[#allocation8 + $0x4c0] sm:$0xff] }
 0x38a   :  { %v990_v27 = vadd.f32 %v989_v36, %v949_v10  ;;  %v1013_v26 = vmax.f32 %v999_v35, %v1000_v6  ;;  %v1301_v10 = vld [vmem:[#allocation8 + $0x5e0] sm:$0xff] }
 0x38b   :  { %1409 = vmatpush.msrb.mxu0 %v1301_v10  ;;  %v1333_v61 = vld [vmem:[#allocation8 + $0x6e0] sm:$0xff]  ;;  %v1238_v10 = vld [vmem:[#allocation8 + $0x3e8] sm:$0xff] }
 0x38c   :  { %v1008_v22 = vmax.f32 %v990_v27, 0.0  ;;  %v1225_v27 = vld [vmem:[#allocation8 + $0x380] sm:$0xff] }
 0x38d   :  { %1410 = vmatpush.msrb.mxu0 %v1297_v39  ;;  %v1189_v42 = vld [vmem:[#allocation8 + $0x260] sm:$0xff]  ;;  %v1170_v39 = vld [vmem:[#allocation8 + $0x1c8] sm:$0xff] }
 0x38e   :  { %v1017_v5 = vmax.f32 %v1007_v50, %v1008_v22  ;;  %v1209_v22 = vld [vmem:[#allocation8 + $0x300] sm:$0xff] }
 0x38f   :  { %v951_v19 = vpop.f32.mrf.mxu0  ;;  %1411 = vmatpush.msrb.mxu0 %v1293_v15  ;;  %v1273_v50 = vld [vmem:[#allocation8 + $0x500] sm:$0xff] }
 0x390   :  { %v952_v48 = vadd.f32 %v951_v19, %v911_v4  ;;  %v1169_v4 = vld [vmem:[#allocation8 + $0x1c0] sm:$0xff] }
 0x391   :  { %v1229_v19 = vld [vmem:[#allocation8 + $0x3a0] sm:$0xff]  ;;  %1412 = vmatpush.msrb.mxu0 %v1289_v23  ;;  %v1162_v23 = vld [vmem:[#allocation8 + $0x188] sm:$0xff] }
 0x392   :  { %v993_v40 = vadd.f32 %v992_v17, %v952_v48  ;;  %v1357_v48 = vld [vmem:[#allocation8 + $0x7a0] sm:$0xff] }
 0x393   :  { %1431 = vmatpush.msrb.mxu1 %v1357_v48  ;;  %v1285_v17 = vld [vmem:[#allocation8 + $0x560] sm:$0xff] }
 0x394   :  { %v1010_v36 = vmax.f32 %v993_v40, 0.0  ;;  %v1281_v40 = vld [vmem:[#allocation8 + $0x540] sm:$0xff]  ;;  %1413 = vmatpush.msrb.mxu0 %v1285_v17  ;;  %v1154_v17 = vld [vmem:[#allocation8 + $0x148] sm:$0xff] }
 0x395   :  { %1432 = vmatpush.msrb.mxu1 %v1353_v18  ;;  %v1121_v55 = vld [vmem:[#allocation8 + $0x40] sm:$0xff]  ;;  %v1218_v18 = vld [vmem:[#allocation8 + $0x348] sm:$0xff] }
 0x396   :  { %v1018_v37 = vmax.f32 %v1009_v41, %v1010_v36  ;;  %v1277_v41 = vld [vmem:[#allocation8 + $0x520] sm:$0xff]  ;;  %1414 = vmatpush.msrb.mxu0 %v1281_v40  ;;  %v1021_v36 = vld [vmem:[%s2994_s9 + $0x10] sm:$0xff]  ;;  %v1150_v40 = vld [vmem:[#allocation8 + $0x128] sm:$0xff] }
 0x397   :  { %1433 = vmatpush.msrb.mxu1 %v1349_v59  ;;  %v1185_v6 = vld [vmem:[#allocation8 + $0x240] sm:$0xff]  ;;  %v1214_v59 = vld [vmem:[#allocation8 + $0x328] sm:$0xff] }
 0x398   :  { %1043 = vmatpush.msrb.mxu2 %v1018_v37  ;;  %1088 = vmatpush.msra.mxu3 %v1018_v37  ;;  %v1269_v37 = vld [vmem:[#allocation8 + $0x4e0] sm:$0xff] }
 0x399   :  { %1415 = vmatpush.msrb.mxu0 %v1277_v41  ;;  %1434 = vmatpush.msrb.mxu1 %v1345_v38  ;;  %v1325_v35 = vld [vmem:[#allocation8 + $0x6a0] sm:$0xff]  ;;  %v1210_v41 = vld [vmem:[#allocation8 + $0x308] sm:$0xff] }
 0x39a   :  { %1044 = vmatpush.msrb.mxu2 %v1017_v5  ;;  %1089 = vmatpush.msra.mxu3 %v1017_v5  ;;  %v1129_v5 = vld [vmem:[#allocation8 + $0x80] sm:$0xff]  ;;  %v1286_v38 = vld [vmem:[#allocation8 + $0x568] sm:$0xff] }
 0x39b   :  { %1416 = vmatpush.msrb.mxu0 %v1273_v50  ;;  %1435 = vmatpush.msrb.mxu1 %v1341_v58  ;;  %v1253_v51 = vld [vmem:[#allocation8 + $0x460] sm:$0xff]  ;;  %v1130_v50 = vld [vmem:[#allocation8 + $0x88] sm:$0xff] }
 0x39c   :  { %1045 = vmatpush.msrb.mxu2 %v1016_v57  ;;  %1090 = vmatpush.msra.mxu3 %v1016_v57  ;;  %v1261_v57 = vld [vmem:[#allocation8 + $0x4a0] sm:$0xff]  ;;  %v1126_v58 = vld [vmem:[#allocation8 + $0x68] sm:$0xff] }
 0x39d   :  { %1417 = vmatpush.msrb.mxu0 %v1269_v37  ;;  %1436 = vmatpush.msrb.mxu1 %v1337_v14  ;;  %v1313_v15 = vld [vmem:[#allocation8 + $0x640] sm:$0xff]  ;;  %v1198_v37 = vld [vmem:[#allocation8 + $0x2a8] sm:$0xff] }
 0x39e   :  { %1046 = vmatpush.msrb.mxu2 %v1015_v44  ;;  %1091 = vmatpush.msra.mxu3 %v1015_v44  ;;  %v1257_v44 = vld [vmem:[#allocation8 + $0x480] sm:$0xff]  ;;  %v1278_v14 = vld [vmem:[#allocation8 + $0x528] sm:$0xff] }
 0x39f   :  { %1418 = vmatpush.msrb.mxu0 %v1265_v56  ;;  %1437 = vmatpush.msrb.mxu1 %v1333_v61  ;;  %v1305_v48 = vld [vmem:[#allocation8 + $0x600] sm:$0xff]  ;;  %v1194_v56 = vld [vmem:[#allocation8 + $0x288] sm:$0xff] }
 0x3a0   :  { %1047 = vmatpush.msrb.mxu2 %v1014_v13  ;;  %1092 = vmatpush.msra.mxu3 %v1014_v13  ;;  %v1181_v13 = vld [vmem:[#allocation8 + $0x220] sm:$0xff]  ;;  %v1274_v61 = vld [vmem:[#allocation8 + $0x508] sm:$0xff] }
 0x3a1   :  { %1419 = vmatpush.msrb.mxu0 %v1261_v57  ;;  %1438 = vmatpush.msrb.mxu1 %v1329_v63  ;;  %v1346_v57 = vld [vmem:[#allocation8 + $0x748] sm:$0xff] }
 0x3a2   :  { %1048 = vmatpush.msrb.mxu2 %v1013_v26  ;;  %1093 = vmatpush.msra.mxu3 %v1013_v26  ;;  %v1321_v26 = vld [vmem:[#allocation8 + $0x680] sm:$0xff]  ;;  %v1182_v63 = vld [vmem:[#allocation8 + $0x228] sm:$0xff] }
 0x3a3   :  { %1420 = vmatpush.msrb.mxu0 %v1257_v44  ;;  %1439 = vmatpush.msrb.mxu1 %v1325_v35  ;;  %v1178_v44 = vld [vmem:[#allocation8 + $0x208] sm:$0xff] }
 0x3a4   :  { %1049 = vmatpush.msrb.mxu2 %v1012_v9  ;;  %1094 = vmatpush.msra.mxu3 %v1012_v9  ;;  %v1113_v9 = vld [vmem:[#allocation8] sm:$0xff]  ;;  %v1258_v35 = vld [vmem:[#allocation8 + $0x488] sm:$0xff] }
 0x3a5   :  { %1421 = vmatpush.msrb.mxu0 %v1253_v51  ;;  %1440 = vmatpush.msrb.mxu1 %v1321_v26  ;;  %v1334_v51 = vld [vmem:[#allocation8 + $0x6e8] sm:$0xff] }
 0x3a6   :  { %1050 = vmatpush.msrb.mxu2 %v2668_v53  ;;  %1095 = vmatpush.msra.mxu3 %v2668_v53  ;;  %v1161_v53 = vld [vmem:[#allocation8 + $0x180] sm:$0xff]  ;;  %v1250_v26 = vld [vmem:[#allocation8 + $0x448] sm:$0xff] }
 0x3a7   :  { %1966 = vmatmul.msk.f32.vlgmr.msrb.gmra.mxu2 %vm508_vm1, %v1019_v24  ;;  %1970 = vmatmul.msk.f32.vlgmr.msra.gmra.mxu3 %vm508_vm1, %v1064_v32  ;;  %v1177_v24 = vld [vmem:[#allocation8 + $0x200] sm:$0xff]  ;;  %v1174_v32 = vld [vmem:[#allocation8 + $0x1e8] sm:$0xff] }
 0x3a8   :  { %1369 = vmatpush.msra.mxu2 %v1173_v11  ;;  %1389 = vmatpush.msrb.mxu3 %v1237_v30  ;;  %v1249_v11 = vld [vmem:[#allocation8 + $0x440] sm:$0xff] }
 0x3a9   :  { %v1317_v30 = vld [vmem:[#allocation8 + $0x660] sm:$0xff]  ;;  %1422 = vmatpush.msrb.mxu0 %v1249_v11  ;;  %v1322_v11 = vld [vmem:[#allocation8 + $0x688] sm:$0xff] }
 0x3aa   :  { %1370 = vmatpush.msra.mxu2 %v1169_v4  ;;  %1390 = vmatpush.msrb.mxu3 %v1233_v33  ;;  %v1234_v4 = vld [vmem:[#allocation8 + $0x3c8] sm:$0xff]  ;;  %v1245_v33 = vld [vmem:[#allocation8 + $0x420] sm:$0xff] }
 0x3ab   :  { %1441 = vmatpush.msrb.mxu1 %v1317_v30  ;;  %1423 = vmatpush.msrb.mxu0 %v1245_v33  ;;  %v1318_v30 = vld [vmem:[#allocation8 + $0x668] sm:$0xff] }
 0x3ac   :  { %1371 = vmatpush.msra.mxu2 %v1165_v12  ;;  %1391 = vmatpush.msrb.mxu3 %v1229_v19  ;;  %v1230_v12 = vld [vmem:[#allocation8 + $0x3a8] sm:$0xff]  ;;  %v1241_v19 = vld [vmem:[#allocation8 + $0x400] sm:$0xff] }
 0x3ad   :  { %1442 = vmatpush.msrb.mxu1 %v1313_v15  ;;  %1424 = vmatpush.msrb.mxu0 %v1241_v19  ;;  %v1306_v33 = vld [vmem:[#allocation8 + $0x608] sm:$0xff]  ;;  %v1175_v19 = vld [vmem:[#allocation8 + $0x1f0] sm:$0xff] }
 0x3ae   :  { %1372 = vmatpush.msra.mxu2 %v1161_v53  ;;  %1392 = vmatpush.msrb.mxu3 %v1225_v27  ;;  %v1226_v53 = vld [vmem:[#allocation8 + $0x388] sm:$0xff] }
 0x3af   :  { %1967 = vmatmul.msk.f32.gmra.mxu2 %vm508_vm1, %v1020_v20  ;;  %1971 = vmatmul.msk.f32.gmra.mxu3 %vm508_vm1, %v1065_v49  ;;  %v1302_v27 = vld [vmem:[#allocation8 + $0x5e8] sm:$0xff] }
 0x3b0   :  { %1373 = vmatpush.msra.mxu2 %v1157_v46  ;;  %1393 = vmatpush.msrb.mxu3 %v1221_v52  ;;  %v1158_v20 = vld [vmem:[#allocation8 + $0x168] sm:$0xff] }
 0x3b1   :  { %v1222_v49 = vld [vmem:[#allocation8 + $0x368] sm:$0xff]  ;;  %1443 = vmatpush.msrb.mxu1 %v1309_v21  ;;  %1489 = vmatpush.msra.mxu0 %v1302_v27  ;;  %v1171_v21 = vld [vmem:[#allocation8 + $0x1d0] sm:$0xff] }
 0x3b2   :  { %1374 = vmatpush.msra.mxu2 %v1153_v47  ;;  %1394 = vmatpush.msrb.mxu3 %v1217_v43  ;;  %v1298_v46 = vld [vmem:[#allocation8 + $0x5c8] sm:$0xff] }
 0x3b3   :  { %v1366_v52 = vld [vmem:[#allocation8 + $0x7e8] sm:$0xff]  ;;  %1444 = vmatpush.msrb.mxu1 %v1305_v48  ;;  %1490 = vmatpush.msra.mxu0 %v1298_v46  ;;  %v1239_v46 = vld [vmem:[#allocation8 + $0x3f0] sm:$0xff] }
 0x3b4   :  { %1375 = vmatpush.msra.mxu2 %v1149_v60  ;;  %1395 = vmatpush.msrb.mxu3 %v1213_v45  ;;  %v1294_v47 = vld [vmem:[#allocation8 + $0x5a8] sm:$0xff] }
 0x3b5   :  { %v1362_v43 = vld [vmem:[#allocation8 + $0x7c8] sm:$0xff]  ;;  %1509 = vmatpush.msra.mxu1 %v1366_v52  ;;  %1491 = vmatpush.msra.mxu0 %v1294_v47  ;;  %v1155_v52 = vld [vmem:[#allocation8 + $0x150] sm:$0xff] }
 0x3b6   :  { %1376 = vmatpush.msra.mxu2 %v1145_v1  ;;  %1396 = vmatpush.msrb.mxu3 %v1209_v22  ;;  %v1290_v60 = vld [vmem:[#allocation8 + $0x588] sm:$0xff]  ;;  %v1231_v47 = vld [vmem:[#allocation8 + $0x3b0] sm:$0xff] }
 0x3b7   :  { %1968 = vmatmul.msk.f32.gmra.mxu2 %vm508_vm1, %v1021_v36  ;;  %1972 = vmatmul.msk.f32.gmra.mxu3 %vm508_vm1, %v1066_v28  ;;  %v1146_v45 = vld [vmem:[#allocation8 + $0x108] sm:$0xff] }
 0x3b8   :  { %1377 = vmatpush.msra.mxu2 %v1141_v29  ;;  %1397 = vmatpush.msrb.mxu3 %v1205_v25  ;;  %v1142_v1 = vld [vmem:[#allocation8 + $0xe8] sm:$0xff] }
 0x3b9   :  { %1510 = vmatpush.msra.mxu1 %v1362_v43  ;;  %1492 = vmatpush.msra.mxu0 %v1290_v60  ;;  %v1206_v22 = vld [vmem:[#allocation8 + $0x2e8] sm:$0xff]  ;;  %v1147_v43 = vld [vmem:[#allocation8 + $0x110] sm:$0xff] }
 0x3ba   :  { %1378 = vmatpush.msra.mxu2 %v1137_v0  ;;  %1398 = vmatpush.msrb.mxu3 %v1201_v2  ;;  %v1282_v36 = vld [vmem:[#allocation8 + $0x548] sm:$0xff] }
 0x3bb   :  { %v1138_v28 = vld [vmem:[#allocation8 + $0xc8] sm:$0xff]  ;;  %1493 = vmatpush.msra.mxu0 %v1286_v38  ;;  %v1223_v38 = vld [vmem:[#allocation8 + $0x370] sm:$0xff] }
 0x3bc   :  { %1379 = vmatpush.msra.mxu2 %v1133_v8  ;;  %1399 = vmatpush.msrb.mxu3 %v1197_v62  ;;  %v1202_v29 = vld [vmem:[#allocation8 + $0x2c8] sm:$0xff] }
 0x3bd   :  { %v1134_v25 = vld [vmem:[#allocation8 + $0xa8] sm:$0xff]  ;;  %1494 = vmatpush.msra.mxu0 %v1282_v36  ;;  %v1219_v36 = vld [vmem:[#allocation8 + $0x350] sm:$0xff] }
 0x3be   :  { %1380 = vmatpush.msra.mxu2 %v1129_v5  ;;  %1400 = vmatpush.msrb.mxu3 %v1193_v3  ;;  %v1122_v0 = vld [vmem:[#allocation8 + $0x48] sm:$0xff] }
 0x3bf   :  { %1969 = vmatmul.msk.f32.gmra.mxu2 %vm508_vm1, %v1022_v31  ;;  %1973 = vmatmul.msk.f32.gmra.mxu3 %vm508_vm1, %v1067_v34  ;;  %v1118_v2 = vld [vmem:[#allocation8 + $0x28] sm:$0xff] }
 0x3c0   :  { %1381 = vmatpush.msra.mxu2 %v1125_v54  ;;  %1401 = vmatpush.msrb.mxu3 %v1189_v42  ;;  %v1358_v8 = vld [vmem:[#allocation8 + $0x7a8] sm:$0xff] }
 0x3c1   :  { %v1114_v62 = vld [vmem:[#allocation8 + $0x8] sm:$0xff]  ;;  %1495 = vmatpush.msra.mxu0 %v1278_v14  ;;  %1511 = vmatpush.msra.mxu1 %v1358_v8  ;;  %v1291_v14 = vld [vmem:[#allocation8 + $0x590] sm:$0xff] }
 0x3c2   :  { %1382 = vmatpush.msra.mxu2 %v1121_v55  ;;  %1402 = vmatpush.msrb.mxu3 %v1185_v6  ;;  %v1354_v5 = vld [vmem:[#allocation8 + $0x788] sm:$0xff] }
 0x3c3   :  { %1496 = vmatpush.msra.mxu0 %v1274_v61  ;;  %1512 = vmatpush.msra.mxu1 %v1354_v5  ;;  %v1190_v3 = vld [vmem:[#allocation8 + $0x268] sm:$0xff]  ;;  %v1287_v61 = vld [vmem:[#allocation8 + $0x570] sm:$0xff] }
 0x3c4   :  { %1383 = vmatpush.msra.mxu2 %v1117_v7  ;;  %1403 = vmatpush.msrb.mxu3 %v1181_v13  ;;  %v1270_v31 = vld [vmem:[#allocation8 + $0x4e8] sm:$0xff]  ;;  %v1367_v5 = vld [vmem:[#allocation8 + $0x7f0] sm:$0xff] }
 0x3c5   :  { %v1350_v34 = vld [vmem:[#allocation8 + $0x768] sm:$0xff]  ;;  %1497 = vmatpush.msra.mxu0 %v1270_v31  ;;  %v1203_v31 = vld [vmem:[#allocation8 + $0x2d0] sm:$0xff] }
 0x3c6   :  { %1384 = vmatpush.msra.mxu2 %v1113_v9  ;;  %1404 = vmatpush.msrb.mxu3 %v1177_v24  ;;  %v1186_v54 = vld [vmem:[#allocation8 + $0x248] sm:$0xff] }
 0x3c7   :  { %1513 = vmatpush.msra.mxu1 %v1350_v34  ;;  %v1266_v42 = vld [vmem:[#allocation8 + $0x4c8] sm:$0xff]  ;;  %v1283_v34 = vld [vmem:[#allocation8 + $0x550] sm:$0xff] }
 0x3c8   :  { %1449 = vmatpush.msrb.mxu2 %v1174_v32  ;;  %1469 = vmatpush.msra.mxu3 %v1238_v10  ;;  %v1262_v55 = vld [vmem:[#allocation8 + $0x4a8] sm:$0xff] }
 0x3c9   :  { %1498 = vmatpush.msra.mxu0 %v1266_v42  ;;  %1514 = vmatpush.msra.mxu1 %v1346_v57  ;;  %v1342_v6 = vld [vmem:[#allocation8 + $0x728] sm:$0xff]  ;;  %v1119_v42 = vld [vmem:[#allocation8 + $0x30] sm:$0xff] }
 0x3ca   :  { %1450 = vmatpush.msrb.mxu2 %v1170_v39  ;;  %1470 = vmatpush.msra.mxu3 %v1234_v4  ;;  %v1338_v7 = vld [vmem:[#allocation8 + $0x708] sm:$0xff]  ;;  %v1199_v57 = vld [vmem:[#allocation8 + $0x2b0] sm:$0xff] }
 0x3cb   :  { %1499 = vmatpush.msra.mxu0 %v1262_v55  ;;  %1515 = vmatpush.msra.mxu1 %v1342_v6  ;;  %v1254_v13 = vld [vmem:[#allocation8 + $0x468] sm:$0xff]  ;;  %v1359_v55 = vld [vmem:[#allocation8 + $0x7b0] sm:$0xff] }
 0x3cc   :  { %1451 = vmatpush.msrb.mxu2 %v1166_v16  ;;  %1471 = vmatpush.msra.mxu3 %v1230_v12  ;;  %v1330_v9 = vld [vmem:[#allocation8 + $0x6c8] sm:$0xff]  ;;  %v1115_v6 = vld [vmem:[#allocation8 + $0x10] sm:$0xff] }
 0x3cd   :  { %1500 = vmatpush.msra.mxu0 %v1258_v35  ;;  %1516 = vmatpush.msra.mxu1 %v1338_v7  ;;  %v1246_v24 = vld [vmem:[#allocation8 + $0x428] sm:$0xff]  ;;  %v1275_v35 = vld [vmem:[#allocation8 + $0x510] sm:$0xff] }
 0x3ce   :  { %1452 = vmatpush.msrb.mxu2 %v1162_v23  ;;  %1472 = vmatpush.msra.mxu3 %v1226_v53  ;;  %v1326_v32 = vld [vmem:[#allocation8 + $0x6a8] sm:$0xff]  ;;  %v1167_v23 = vld [vmem:[#allocation8 + $0x1b0] sm:$0xff] }
 0x3cf   :  { %1501 = vmatpush.msra.mxu0 %v1254_v13  ;;  %1517 = vmatpush.msra.mxu1 %v1334_v51  ;;  %v1242_v10 = vld [vmem:[#allocation8 + $0x408] sm:$0xff]  ;;  %v1163_v53 = vld [vmem:[#allocation8 + $0x190] sm:$0xff]  ;;  %v1176_v51 = vld [vmem:[#allocation8 + $0x1f8] sm:$0xff] }
 0x3d0   :  { %1453 = vmatpush.msrb.mxu2 %v1158_v20  ;;  %1473 = vmatpush.msra.mxu3 %v1222_v49  ;;  %v1314_v39 = vld [vmem:[#allocation8 + $0x648] sm:$0xff]  ;;  %v1159_v49 = vld [vmem:[#allocation8 + $0x170] sm:$0xff] }
 0x3d1   :  { %1502 = vmatpush.msra.mxu0 %v1250_v26  ;;  %1518 = vmatpush.msra.mxu1 %v1330_v9  ;;  %v1310_v4 = vld [vmem:[#allocation8 + $0x628] sm:$0xff]  ;;  %v1355_v7 = vld [vmem:[#allocation8 + $0x790] sm:$0xff] }
 0x3d2   :  { %1454 = vmatpush.msrb.mxu2 %v1154_v17  ;;  %1474 = vmatpush.msra.mxu3 %v1218_v18  ;;  %v1235_v17 = vld [vmem:[#allocation8 + $0x3d0] sm:$0xff] }
 0x3d3   :  { %1503 = vmatpush.msra.mxu0 %v1246_v24  ;;  %1519 = vmatpush.msra.mxu1 %v1326_v32  ;;  %v1151_v18 = vld [vmem:[#allocation8 + $0x130] sm:$0xff]  ;;  %v1172_v24 = vld [vmem:[#allocation8 + $0x1d8] sm:$0xff] }
 0x3d4   :  { %1455 = vmatpush.msrb.mxu2 %v1150_v40  ;;  %1475 = vmatpush.msra.mxu3 %v1214_v59  ;;  %v1227_v40 = vld [vmem:[#allocation8 + $0x390] sm:$0xff] }
 0x3d5   :  { %1504 = vmatpush.msra.mxu0 %v1242_v10  ;;  %1520 = vmatpush.msra.mxu1 %v1322_v11  ;;  %v1191_v13 = vld [vmem:[#allocation8 + $0x270] sm:$0xff] }
 0x3d6   :  { %1456 = vmatpush.msrb.mxu2 %v1146_v45  ;;  %1476 = vmatpush.msra.mxu3 %v1210_v41  ;;  %v1143_v41 = vld [vmem:[#allocation8 + $0xf0] sm:$0xff] }
 0x3d7   :  { %1521 = vmatpush.msra.mxu1 %v1318_v30  ;;  %v1271_v26 = vld [vmem:[#allocation8 + $0x4f0] sm:$0xff]  ;;  %v1168_v30 = vld [vmem:[#allocation8 + $0x1b8] sm:$0xff] }
 0x3d8   :  { %1457 = vmatpush.msrb.mxu2 %v1142_v1  ;;  %1477 = vmatpush.msra.mxu3 %v1206_v22  ;;  %v1303_v1 = vld [vmem:[#allocation8 + $0x5f0] sm:$0xff] }
 0x3d9   :  { %1522 = vmatpush.msra.mxu1 %v1314_v39  ;;  %v1139_v22 = vld [vmem:[#allocation8 + $0xd0] sm:$0xff] }
 0x3da   :  { %1458 = vmatpush.msrb.mxu2 %v1138_v28  ;;  %1478 = vmatpush.msra.mxu3 %v1202_v29  ;;  %v1299_v28 = vld [vmem:[#allocation8 + $0x5d0] sm:$0xff] }
 0x3db   :  { %1523 = vmatpush.msra.mxu1 %v1310_v4  ;;  %v1135_v29 = vld [vmem:[#allocation8 + $0xb0] sm:$0xff] }
 0x3dc   :  { %1459 = vmatpush.msrb.mxu2 %v1134_v25  ;;  %1479 = vmatpush.msra.mxu3 %v1198_v37  ;;  %v1215_v25 = vld [vmem:[#allocation8 + $0x330] sm:$0xff] }
 0x3dd   :  { %1524 = vmatpush.msra.mxu1 %v1306_v33  ;;  %v1351_v9 = vld [vmem:[#allocation8 + $0x770] sm:$0xff] }
 0x3de   :  { %1460 = vmatpush.msrb.mxu2 %v1130_v50  ;;  %1480 = vmatpush.msra.mxu3 %v1194_v56  ;;  %v1295_v50 = vld [vmem:[#allocation8 + $0x5b0] sm:$0xff] }
 0x3df   :  { %v1207_v56 = vld [vmem:[#allocation8 + $0x2f0] sm:$0xff] }
 0x3e0   :  { %1461 = vmatpush.msrb.mxu2 %v1126_v58  ;;  %1481 = vmatpush.msra.mxu3 %v1190_v3  ;;  %v1131_v58 = vld [vmem:[#allocation8 + $0x90] sm:$0xff] }
 0x3e1   :  { %v1123_v3 = vld [vmem:[#allocation8 + $0x50] sm:$0xff] }
 0x3e2   :  { %1462 = vmatpush.msrb.mxu2 %v1122_v0  ;;  %1482 = vmatpush.msra.mxu3 %v1186_v54  ;;  %v1211_v0 = vld [vmem:[#allocation8 + $0x310] sm:$0xff] }
 0x3e3   :  { %v1363_v54 = vld [vmem:[#allocation8 + $0x7d0] sm:$0xff] }
 0x3e4   :  { %1463 = vmatpush.msrb.mxu2 %v1118_v2  ;;  %1483 = vmatpush.msra.mxu3 %v1182_v63  ;;  %v1279_v63 = vld [vmem:[#allocation8 + $0x530] sm:$0xff] }
 0x3e5   :  { %v1187_v32 = vld [vmem:[#allocation8 + $0x250] sm:$0xff] }
 0x3e6   :  { %1464 = vmatpush.msrb.mxu2 %v1114_v62  ;;  %1484 = vmatpush.msra.mxu3 %v1178_v44  ;;  %v1127_v62 = vld [vmem:[#allocation8 + $0x70] sm:$0xff] }
 0x3e7   :  { %v1195_v44 = vld [vmem:[#allocation8 + $0x290] sm:$0xff] }
 0x3e8   :  { %v1267_v10 = vld [vmem:[#allocation8 + $0x4d0] sm:$0xff] }
 0x3e9   :  { %v1347_v11 = vld [vmem:[#allocation8 + $0x750] sm:$0xff] }
 0x3ea   :  { %v1183_v39 = vld [vmem:[#allocation8 + $0x230] sm:$0xff] }
 0x3eb   :  { %v1263_v4 = vld [vmem:[#allocation8 + $0x4b0] sm:$0xff] }
 0x3ec   :  { %v1343_v33 = vld [vmem:[#allocation8 + $0x730] sm:$0xff] }
 0x42a   :  { %v1052_v15 = vpop.f32.mrf.mxu2  ;;  %v1097_v16 = vpop.f32.mrf.mxu3 }
 0x42b   :  { %v2712_v12 = vmax.f32 %v1052_v15, %v1097_v16  ;;  %v1164_v15 = vld [vmem:[#allocation8 + $0x198] sm:$0xff]  ;;  %v1179_v16 = vld [vmem:[#allocation8 + $0x210] sm:$0xff] }
 0x42d   :  { %1385 = vmatmul.f32.vlgmr.msra.gmra.mxu2 %v2712_v12 }
 0x42e   :  { %1529 = vmatpush.msra.mxu2 %v1175_v19  ;;  %v1259_v19 = vld [vmem:[#allocation8 + $0x490] sm:$0xff] }
 0x430   :  { %1530 = vmatpush.msra.mxu2 %v1171_v21  ;;  %v1339_v21 = vld [vmem:[#allocation8 + $0x710] sm:$0xff] }
 0x432   :  { %1531 = vmatpush.msra.mxu2 %v1167_v23  ;;  %v1055_v27 = vpop.f32.mrf.mxu2  ;;  %v1100_v48 = vpop.f32.mrf.mxu3  ;;  %v1160_v23 = vld [vmem:[#allocation8 + $0x178] sm:$0xff] }
 0x433   :  { %v2715_v20 = vmax.f32 %v1055_v27, %v1100_v48  ;;  %v1255_v27 = vld [vmem:[#allocation8 + $0x470] sm:$0xff] }
 0x434   :  { %1532 = vmatpush.msra.mxu2 %v1163_v53  ;;  %v1240_v53 = vld [vmem:[#allocation8 + $0x3f8] sm:$0xff]  ;;  %v1335_v48 = vld [vmem:[#allocation8 + $0x6f0] sm:$0xff] }
 0x435   :  { %1405 = vmatmul.f32.vlgmr.msrb.gmra.mxu3 %v2715_v20  ;;  %1465 = vmatmul.f32.vlgmr.msrb.gmra.mxu2 %v2712_v12 }
 0x436   :  { %1533 = vmatpush.msra.mxu2 %v1159_v49  ;;  %1549 = vmatpush.msrb.mxu3 %v1239_v46  ;;  %v1156_v49 = vld [vmem:[#allocation8 + $0x158] sm:$0xff] }
 0x437   :  { %v1236_v46 = vld [vmem:[#allocation8 + $0x3d8] sm:$0xff] }
 0x438   :  { %1534 = vmatpush.msra.mxu2 %v1155_v52  ;;  %1550 = vmatpush.msrb.mxu3 %v1235_v17  ;;  %v1251_v52 = vld [vmem:[#allocation8 + $0x450] sm:$0xff] }
 0x439   :  { %v1331_v17 = vld [vmem:[#allocation8 + $0x6d0] sm:$0xff] }
 0x43a   :  { %1535 = vmatpush.msra.mxu2 %v1151_v18  ;;  %1551 = vmatpush.msrb.mxu3 %v1231_v47  ;;  %v1058_v59 = vpop.f32.mrf.mxu2  ;;  %v1103_v60 = vpop.f32.mrf.mxu3  ;;  %v1152_v18 = vld [vmem:[#allocation8 + $0x138] sm:$0xff] }
 0x43b   :  { %v2719_v45 = vmax.f32 %v1058_v59, %v1103_v60  ;;  %v1232_v47 = vld [vmem:[#allocation8 + $0x3b8] sm:$0xff] }
 0x43c   :  { %1536 = vmatpush.msra.mxu2 %v1147_v43  ;;  %1552 = vmatpush.msrb.mxu3 %v1227_v40  ;;  %v1247_v43 = vld [vmem:[#allocation8 + $0x430] sm:$0xff]  ;;  %v1148_v59 = vld [vmem:[#allocation8 + $0x118] sm:$0xff] }
 0x43d   :  { %1425 = vmatmul.f32.vlgmr.msrb.gmra.mxu0 %v2719_v45  ;;  %1485 = vmatmul.f32.vlgmr.msra.gmra.mxu3 %v2715_v20  ;;  %v1327_v40 = vld [vmem:[#allocation8 + $0x6b0] sm:$0xff]  ;;  %v1228_v60 = vld [vmem:[#allocation8 + $0x398] sm:$0xff] }
 0x43e   :  { %1537 = vmatpush.msra.mxu2 %v1143_v41  ;;  %1553 = vmatpush.msrb.mxu3 %v1223_v38  ;;  %v1243_v41 = vld [vmem:[#allocation8 + $0x410] sm:$0xff] }
 0x43f   :  { %1569 = vmatpush.msrb.mxu0 %v1303_v1  ;;  %v1323_v38 = vld [vmem:[#allocation8 + $0x690] sm:$0xff]  ;;  %v1144_v1 = vld [vmem:[#allocation8 + $0xf8] sm:$0xff] }
 0x440   :  { %1538 = vmatpush.msra.mxu2 %v1139_v22  ;;  %1554 = vmatpush.msrb.mxu3 %v1219_v36  ;;  %v1224_v22 = vld [vmem:[#allocation8 + $0x378] sm:$0xff] }
 0x441   :  { %1570 = vmatpush.msrb.mxu0 %v1299_v28  ;;  %v1304_v36 = vld [vmem:[#allocation8 + $0x5f8] sm:$0xff]  ;;  %v1319_v28 = vld [vmem:[#allocation8 + $0x670] sm:$0xff] }
 0x442   :  { %1539 = vmatpush.msra.mxu2 %v1135_v29  ;;  %1555 = vmatpush.msrb.mxu3 %v1215_v25  ;;  %v1061_v2 = vpop.f32.mrf.mxu2  ;;  %v1106_v37 = vpop.f32.mrf.mxu3  ;;  %v1140_v29 = vld [vmem:[#allocation8 + $0xd8] sm:$0xff] }
 0x443   :  { %1571 = vmatpush.msrb.mxu0 %v1295_v50  ;;  %v2723_v8 = vmax.f32 %v1061_v2, %v1106_v37  ;;  %v1220_v25 = vld [vmem:[#allocation8 + $0x358] sm:$0xff] }
 0x444   :  { %1540 = vmatpush.msra.mxu2 %v1131_v58  ;;  %1556 = vmatpush.msrb.mxu3 %v1211_v0  ;;  %v1300_v50 = vld [vmem:[#allocation8 + $0x5d8] sm:$0xff]  ;;  %v1315_v58 = vld [vmem:[#allocation8 + $0x650] sm:$0xff] }
 0x445   :  { %1572 = vmatpush.msrb.mxu0 %v1291_v14  ;;  %1445 = vmatmul.f32.vlgmr.msrb.gmra.mxu1 %v2723_v8  ;;  %v1136_v0 = vld [vmem:[#allocation8 + $0xb8] sm:$0xff]  ;;  %v1311_v14 = vld [vmem:[#allocation8 + $0x630] sm:$0xff] }
 0x446   :  { %1541 = vmatpush.msra.mxu2 %v1127_v62  ;;  %1557 = vmatpush.msrb.mxu3 %v1207_v56  ;;  %v1216_v2 = vld [vmem:[#allocation8 + $0x338] sm:$0xff] }
 0x447   :  { %1573 = vmatpush.msrb.mxu0 %v1287_v61  ;;  %1589 = vmatpush.msrb.mxu1 %v1367_v5  ;;  %v1296_v37 = vld [vmem:[#allocation8 + $0x5b8] sm:$0xff]  ;;  %v1307_v5 = vld [vmem:[#allocation8 + $0x610] sm:$0xff] }
 0x448   :  { %1542 = vmatpush.msra.mxu2 %v1123_v3  ;;  %1558 = vmatpush.msrb.mxu3 %v1203_v31  ;;  %v1132_v62 = vld [vmem:[#allocation8 + $0x98] sm:$0xff] }
 0x449   :  { %1574 = vmatpush.msrb.mxu0 %v1283_v34  ;;  %1590 = vmatpush.msrb.mxu1 %v1363_v54  ;;  %v1212_v56 = vld [vmem:[#allocation8 + $0x318] sm:$0xff] }
 0x44a   :  { %1543 = vmatpush.msra.mxu2 %v1119_v42  ;;  %1559 = vmatpush.msrb.mxu3 %v1199_v57  ;;  %v1292_v61 = vld [vmem:[#allocation8 + $0x598] sm:$0xff] }
 0x44b   :  { %1575 = vmatpush.msrb.mxu0 %v1279_v63  ;;  %1591 = vmatpush.msrb.mxu1 %v1359_v55  ;;  %v1128_v3 = vld [vmem:[#allocation8 + $0x78] sm:$0xff] }
 0x44c   :  { %1544 = vmatpush.msra.mxu2 %v1115_v6  ;;  %1560 = vmatpush.msrb.mxu3 %v1195_v44  ;;  %v1208_v31 = vld [vmem:[#allocation8 + $0x2f8] sm:$0xff] }
 0x44d   :  { %1576 = vmatpush.msrb.mxu0 %v1275_v35  ;;  %1592 = vmatpush.msrb.mxu1 %v1355_v7  ;;  %v1288_v34 = vld [vmem:[#allocation8 + $0x578] sm:$0xff] }
 0x44e   :  { %1545 = vmatmul.f32.vlgmr.msra.gmra.mxu2 %v2712_v12  ;;  %1561 = vmatpush.msrb.mxu3 %v1191_v13  ;;  %v1368_v54 = vld [vmem:[#allocation8 + $0x7f8] sm:$0xff] }
 0x44f   :  { %1609 = vmatpush.msrb.mxu2 %v1176_v51  ;;  %1577 = vmatpush.msrb.mxu0 %v1271_v26  ;;  %v1124_v42 = vld [vmem:[#allocation8 + $0x58] sm:$0xff] }
 0x450   :  { %1593 = vmatpush.msrb.mxu1 %v1351_v9  ;;  %1505 = vmatmul.f32.vlgmr.msra.gmra.mxu0 %v2719_v45  ;;  %v1204_v57 = vld [vmem:[#allocation8 + $0x2d8] sm:$0xff] }
 0x451   :  { %1610 = vmatpush.msrb.mxu2 %v1172_v24  ;;  %1562 = vmatpush.msrb.mxu3 %v1187_v32  ;;  %v1284_v63 = vld [vmem:[#allocation8 + $0x558] sm:$0xff] }
 0x452   :  { %1578 = vmatpush.msrb.mxu0 %v1267_v10  ;;  %1594 = vmatpush.msrb.mxu1 %v1347_v11  ;;  %v1364_v55 = vld [vmem:[#allocation8 + $0x7d8] sm:$0xff] }
 0x453   :  { %1611 = vmatpush.msrb.mxu2 %v1168_v30  ;;  %1525 = vmatmul.f32.vlgmr.msra.gmra.mxu1 %v2723_v8  ;;  %v1120_v6 = vld [vmem:[#allocation8 + $0x38] sm:$0xff] }
 0x454   :  { %1563 = vmatpush.msrb.mxu3 %v1183_v39  ;;  %1579 = vmatpush.msrb.mxu0 %v1263_v4  ;;  %v1200_v44 = vld [vmem:[#allocation8 + $0x2b8] sm:$0xff] }
 0x455   :  { %1595 = vmatpush.msrb.mxu1 %v1343_v33  ;;  %1612 = vmatpush.msrb.mxu2 %v1164_v15  ;;  %v1280_v35 = vld [vmem:[#allocation8 + $0x538] sm:$0xff]  ;;  %v1707_v15 = vld [vmem:[%s2997_s12 + $0x70] sm:$0xff] }
 0x456   :  { %1564 = vmatpush.msrb.mxu3 %v1179_v16  ;;  %1580 = vmatpush.msrb.mxu0 %v1259_v19  ;;  %v1360_v7 = vld [vmem:[#allocation8 + $0x7b8] sm:$0xff] }
 0x457   :  { %1596 = vmatpush.msrb.mxu1 %v1339_v21  ;;  %1565 = vmatmul.f32.vlgmr.msrb.gmra.mxu3 %v2715_v20  ;;  %v1116_v13 = vld [vmem:[#allocation8 + $0x18] sm:$0xff] }
 0x458   :  { %1613 = vmatpush.msrb.mxu2 %v1160_v23  ;;  %1629 = vmatpush.msra.mxu3 %v1240_v53  ;;  %v1196_v51 = vld [vmem:[#allocation8 + $0x298] sm:$0xff] }
 0x459   :  { %1581 = vmatpush.msrb.mxu0 %v1255_v27  ;;  %1597 = vmatpush.msrb.mxu1 %v1335_v48  ;;  %v1276_v26 = vld [vmem:[#allocation8 + $0x518] sm:$0xff]  ;;  %v1705_v27 = vld [vmem:[%s2997_s12 + $0x60] sm:$0xff] }
 0x45a   :  { %1614 = vmatpush.msrb.mxu2 %v1156_v49  ;;  %1630 = vmatpush.msra.mxu3 %v1236_v46  ;;  %v1356_v9 = vld [vmem:[#allocation8 + $0x798] sm:$0xff] }
 0x45b   :  { %1582 = vmatpush.msrb.mxu0 %v1251_v52  ;;  %1598 = vmatpush.msrb.mxu1 %v1331_v17  ;;  %v1192_v24 = vld [vmem:[#allocation8 + $0x278] sm:$0xff] }
 0x45c   :  { %1615 = vmatpush.msrb.mxu2 %v1152_v18  ;;  %1631 = vmatpush.msra.mxu3 %v1232_v47  ;;  %v1272_v32 = vld [vmem:[#allocation8 + $0x4f8] sm:$0xff]  ;;  %v1723_v47 = vld [vmem:[%s2997_s12 + $0xf0] sm:$0xff] }
 0x45d   :  { %1583 = vmatpush.msrb.mxu0 %v1247_v43  ;;  %1599 = vmatpush.msrb.mxu1 %v1327_v40  ;;  %v1352_v10 = vld [vmem:[#allocation8 + $0x778] sm:$0xff]  ;;  %v1703_v43 = vld [vmem:[%s2997_s12 + $0x50] sm:$0xff] }
 0x45e   :  { %1616 = vmatpush.msrb.mxu2 %v1148_v59  ;;  %1632 = vmatpush.msra.mxu3 %v1228_v60  ;;  %v1188_v11 = vld [vmem:[#allocation8 + $0x258] sm:$0xff]  ;;  %v1702_v60 = vld [vmem:[%s2997_s12 + $0x48] sm:$0xff] }
 0x45f   :  { %1584 = vmatpush.msrb.mxu0 %v1243_v41  ;;  %1600 = vmatpush.msrb.mxu1 %v1323_v38  ;;  %v1708_v30 = vld [vmem:[%s2997_s12 + $0x78] sm:$0xff] }
 0x460   :  { %1585 = vmatmul.f32.vlgmr.msrb.gmra.mxu0 %v2719_v45  ;;  %1617 = vmatpush.msrb.mxu2 %v1144_v1  ;;  %v1268_v39 = vld [vmem:[#allocation8 + $0x4d8] sm:$0xff]  ;;  %v1721_v1 = vld [vmem:[%s2997_s12 + $0xe0] sm:$0xff] }
 0x461   :  { %1633 = vmatpush.msra.mxu3 %v1224_v22  ;;  %1649 = vmatpush.msra.mxu0 %v1304_v36  ;;  %v1348_v4 = vld [vmem:[#allocation8 + $0x758] sm:$0xff]  ;;  %v1701_v36 = vld [vmem:[%s2997_s12 + $0x40] sm:$0xff] }
 0x462   :  { %1601 = vmatpush.msrb.mxu1 %v1319_v28  ;;  %1618 = vmatpush.msrb.mxu2 %v1140_v29  ;;  %v1184_v33 = vld [vmem:[#allocation8 + $0x238] sm:$0xff] }
 0x463   :  { %1634 = vmatpush.msra.mxu3 %v1220_v25  ;;  %1650 = vmatpush.msra.mxu0 %v1300_v50  ;;  %v1264_v16 = vld [vmem:[#allocation8 + $0x4b8] sm:$0xff]  ;;  %v1719_v25 = vld [vmem:[%s2997_s12 + $0xd0] sm:$0xff] }
 0x464   :  { %1602 = vmatpush.msrb.mxu1 %v1315_v58  ;;  %1619 = vmatpush.msrb.mxu2 %v1136_v0  ;;  %v1344_v19 = vld [vmem:[#allocation8 + $0x738] sm:$0xff]  ;;  %v1718_v58 = vld [vmem:[%s2997_s12 + $0xc8] sm:$0xff] }
 0x465   :  { %1635 = vmatpush.msra.mxu3 %v1216_v2  ;;  %1651 = vmatpush.msra.mxu0 %v1296_v37  ;;  %v1180_v21 = vld [vmem:[#allocation8 + $0x218] sm:$0xff]  ;;  %v1717_v2 = vld [vmem:[%s2997_s12 + $0xc0] sm:$0xff]  ;;  %v1699_v37 = vld [vmem:[%s2997_s12 + $0x30] sm:$0xff] }
 0x466   :  { %1603 = vmatpush.msrb.mxu1 %v1311_v14  ;;  %1620 = vmatpush.msrb.mxu2 %v1132_v62  ;;  %v1260_v23 = vld [vmem:[#allocation8 + $0x498] sm:$0xff]  ;;  %v1715_v62 = vld [vmem:[%s2997_s12 + $0xb0] sm:$0xff] }
 0x467   :  { %1636 = vmatpush.msra.mxu3 %v1212_v56  ;;  %1652 = vmatpush.msra.mxu0 %v1292_v61  ;;  %v1340_v53 = vld [vmem:[#allocation8 + $0x718] sm:$0xff]  ;;  %v1697_v61 = vld [vmem:[%s2997_s12 + $0x20] sm:$0xff] }
 0x468   :  { %1604 = vmatpush.msrb.mxu1 %v1307_v5  ;;  %1621 = vmatpush.msrb.mxu2 %v1128_v3  ;;  %v1256_v48 = vld [vmem:[#allocation8 + $0x478] sm:$0xff]  ;;  %v1714_v5 = vld [vmem:[%s2997_s12 + $0xa8] sm:$0xff]  ;;  %v1739_v3 = vld [vmem:[%s2997_s12 + $0x170] sm:$0xff] }
 0x469   :  { %1605 = vmatmul.f32.vlgmr.msrb.gmra.mxu1 %v2723_v8  ;;  %1637 = vmatpush.msra.mxu3 %v1208_v31  ;;  %v1336_v49 = vld [vmem:[#allocation8 + $0x6f8] sm:$0xff] }
 0x46a   :  { %1653 = vmatpush.msra.mxu0 %v1288_v34  ;;  %1669 = vmatpush.msra.mxu1 %v1368_v54  ;;  %v1724_v46 = vld [vmem:[%s2997_s12 + $0xf8] sm:$0xff]  ;;  %v1713_v34 = vld [vmem:[%s2997_s12 + $0xa0] sm:$0xff]  ;;  %v1738_v54 = vld [vmem:[%s2997_s12 + $0x168] sm:$0xff] }
 0x46b   :  { %1622 = vmatpush.msrb.mxu2 %v1124_v42  ;;  %1638 = vmatpush.msra.mxu3 %v1204_v57  ;;  %v1704_v52 = vld [vmem:[%s2997_s12 + $0x58] sm:$0xff]  ;;  %v1695_v42 = vld [vmem:[%s2997_s12 + $0x10] sm:$0xff] }
 0x46c   :  { %1654 = vmatpush.msra.mxu0 %v1284_v63  ;;  %1670 = vmatpush.msra.mxu1 %v1364_v55  ;;  %v1252_v17 = vld [vmem:[#allocation8 + $0x458] sm:$0xff]  ;;  %v1737_v63 = vld [vmem:[%s2997_s12 + $0x160] sm:$0xff]  ;;  %v1694_v55 = vld [vmem:[%s2997_s12 + $0x8] sm:$0xff] }
 0x46d   :  { %1623 = vmatpush.msrb.mxu2 %v1120_v6  ;;  %1639 = vmatpush.msra.mxu3 %v1200_v44  ;;  %v1332_v18 = vld [vmem:[#allocation8 + $0x6d8] sm:$0xff]  ;;  %v1711_v6 = vld [vmem:[%s2997_s12 + $0x90] sm:$0xff] }
 0x46e   :  { %1655 = vmatpush.msra.mxu0 %v1280_v35  ;;  %1671 = vmatpush.msra.mxu1 %v1360_v7  ;;  %v1248_v40 = vld [vmem:[#allocation8 + $0x438] sm:$0xff]  ;;  %v1693_v35 = vld [vmem:[%s2997_s12] sm:$0xff]  ;;  %v1710_v7 = vld [vmem:[%s2997_s12 + $0x88] sm:$0xff] }
 0x46f   :  { %1624 = vmatpush.msrb.mxu2 %v1116_v13  ;;  %1640 = vmatpush.msra.mxu3 %v1196_v51  ;;  %v1328_v59 = vld [vmem:[#allocation8 + $0x6b8] sm:$0xff]  ;;  %v1735_v13 = vld [vmem:[%s2997_s12 + $0x150] sm:$0xff]  ;;  %v1709_v51 = vld [vmem:[%s2997_s12 + $0x80] sm:$0xff] }
 0x470   :  { %1656 = vmatpush.msra.mxu0 %v1276_v26  ;;  %1672 = vmatpush.msra.mxu1 %v1356_v9  ;;  %v1244_v41 = vld [vmem:[#allocation8 + $0x418] sm:$0xff]  ;;  %v1734_v26 = vld [vmem:[%s2997_s12 + $0x148] sm:$0xff]  ;;  %v1733_v9 = vld [vmem:[%s2997_s12 + $0x140] sm:$0xff] }
 0x471   :  { %1625 = vmatmul.f32.vlgmr.msrb.gmra.mxu2 %v2712_v12  ;;  %1641 = vmatpush.msra.mxu3 %v1192_v24  ;;  %v1706_v12 = vld [vmem:[%s2997_s12 + $0x68] sm:$0xff]  ;;  %v1324_v38 = vld [vmem:[#allocation8 + $0x698] sm:$0xff] }
 0x472   :  { %1657 = vmatpush.msra.mxu0 %v1272_v32  ;;  %1673 = vmatpush.msra.mxu1 %v1352_v10  ;;  %v1320_v22 = vld [vmem:[#allocation8 + $0x678] sm:$0xff]  ;;  %v1731_v10 = vld [vmem:[%s2997_s12 + $0x130] sm:$0xff] }
 0x473   :  { %1642 = vmatpush.msra.mxu3 %v1188_v11  ;;  %1761 = vmatpush.msra.mxu2 %v1708_v30  ;;  %v1720_v28 = vld [vmem:[%s2997_s12 + $0xd8] sm:$0xff] }
 0x474   :  { %1658 = vmatpush.msra.mxu0 %v1268_v39  ;;  %1674 = vmatpush.msra.mxu1 %v1348_v4  ;;  %v1316_v29 = vld [vmem:[#allocation8 + $0x658] sm:$0xff]  ;;  %v1730_v4 = vld [vmem:[%s2997_s12 + $0x128] sm:$0xff] }
 0x475   :  { %1643 = vmatpush.msra.mxu3 %v1184_v33  ;;  %1762 = vmatpush.msra.mxu2 %v1707_v15  ;;  %v1312_v50 = vld [vmem:[#allocation8 + $0x638] sm:$0xff]  ;;  %v1729_v33 = vld [vmem:[%s2997_s12 + $0x120] sm:$0xff] }
 0x476   :  { %1659 = vmatpush.msra.mxu0 %v1264_v16  ;;  %1675 = vmatpush.msra.mxu1 %v1344_v19  ;;  %v1308_v0 = vld [vmem:[#allocation8 + $0x618] sm:$0xff] }
 0x477   :  { %1644 = vmatpush.msra.mxu3 %v1180_v21  ;;  %1763 = vmatpush.msra.mxu2 %v1706_v12  ;;  %v1716_v14 = vld [vmem:[%s2997_s12 + $0xb8] sm:$0xff]  ;;  %v1727_v21 = vld [vmem:[%s2997_s12 + $0x110] sm:$0xff] }
 0x478   :  { %1660 = vmatpush.msra.mxu0 %v1260_v23  ;;  %1676 = vmatpush.msra.mxu1 %v1340_v53  ;;  %v1740_v56 = vld [vmem:[%s2997_s12 + $0x178] sm:$0xff]  ;;  %v1726_v53 = vld [vmem:[%s2997_s12 + $0x108] sm:$0xff] }
 0x479   :  { %1645 = vmatmul.f32.vlgmr.msra.gmra.mxu3 %v2715_v20  ;;  %1764 = vmatpush.msra.mxu2 %v1705_v27  ;;  %v1722_v20 = vld [vmem:[%s2997_s12 + $0xe8] sm:$0xff]  ;;  %v1696_v31 = vld [vmem:[%s2997_s12 + $0x18] sm:$0xff]  ;;  %v1725_v27 = vld [vmem:[%s2997_s12 + $0x100] sm:$0xff] }
 0x47a   :  { %1661 = vmatpush.msra.mxu0 %v1256_v48  ;;  %1677 = vmatpush.msra.mxu1 %v1336_v49  ;;  %v1712_v57 = vld [vmem:[%s2997_s12 + $0x98] sm:$0xff] }
 0x47b   :  { %1781 = vmatpush.msrb.mxu3 %v1724_v46  ;;  %1765 = vmatpush.msra.mxu2 %v1704_v52  ;;  %v1736_v44 = vld [vmem:[%s2997_s12 + $0x158] sm:$0xff]  ;;  %v1755_v46 = vld [vmem:[%s2997_s12 + $0x1f0] sm:$0xff] }
 0x47c   :  { %1662 = vmatpush.msra.mxu0 %v1252_v17  ;;  %1678 = vmatpush.msra.mxu1 %v1332_v18  ;;  %v1732_v24 = vld [vmem:[%s2997_s12 + $0x138] sm:$0xff]  ;;  %v1754_v17 = vld [vmem:[%s2997_s12 + $0x1e8] sm:$0xff] }
 0x47d   :  { %1782 = vmatpush.msrb.mxu3 %v1723_v47  ;;  %1766 = vmatpush.msra.mxu2 %v1703_v43  ;;  %v1728_v15 = vld [vmem:[%s2997_s12 + $0x118] sm:$0xff]  ;;  %v1753_v47 = vld [vmem:[%s2997_s12 + $0x1e0] sm:$0xff] }
 0x47e   :  { %1663 = vmatpush.msra.mxu0 %v1248_v40  ;;  %1679 = vmatpush.msra.mxu1 %v1328_v59  ;;  %v1756_v48 = vld [vmem:[%s2997_s12 + $0x1f8] sm:$0xff] }
 0x47f   :  { %1783 = vmatpush.msrb.mxu3 %v1722_v20  ;;  %1767 = vmatpush.msra.mxu2 %v1702_v60  ;;  %v1752_v40 = vld [vmem:[%s2997_s12 + $0x1d8] sm:$0xff]  ;;  %v1751_v60 = vld [vmem:[%s2997_s12 + $0x1d0] sm:$0xff] }
 0x480   :  { %1664 = vmatpush.msra.mxu0 %v1244_v41  ;;  %1680 = vmatpush.msra.mxu1 %v1324_v38  ;;  %v1750_v41 = vld [vmem:[%s2997_s12 + $0x1c8] sm:$0xff]  ;;  %v1749_v38 = vld [vmem:[%s2997_s12 + $0x1c0] sm:$0xff] }
 0x481   :  { %1665 = vmatmul.f32.vlgmr.msra.gmra.mxu0 %v2719_v45  ;;  %1784 = vmatpush.msrb.mxu3 %v1721_v1  ;;  %v1700_v45 = vld [vmem:[%s2997_s12 + $0x38] sm:$0xff] }
 0x482   :  { %1681 = vmatpush.msra.mxu1 %v1320_v22  ;;  %1768 = vmatpush.msra.mxu2 %v1701_v36  ;;  %v1748_v1 = vld [vmem:[%s2997_s12 + $0x1b8] sm:$0xff]  ;;  %v1747_v22 = vld [vmem:[%s2997_s12 + $0x1b0] sm:$0xff] }
 0x483   :  { %1785 = vmatpush.msrb.mxu3 %v1720_v28  ;;  %1801 = vmatpush.msrb.mxu0 %v1740_v56  ;;  %v1746_v28 = vld [vmem:[%s2997_s12 + $0x1a8] sm:$0xff] }
 0x484   :  { %1682 = vmatpush.msra.mxu1 %v1316_v29  ;;  %1769 = vmatpush.msra.mxu2 %v1700_v45  ;;  %v1745_v29 = vld [vmem:[%s2997_s12 + $0x1a0] sm:$0xff]  ;;  %v1743_v45 = vld [vmem:[%s2997_s12 + $0x190] sm:$0xff] }
 0x485   :  { %1786 = vmatpush.msrb.mxu3 %v1719_v25  ;;  %1802 = vmatpush.msrb.mxu0 %v1739_v3 }
 0x486   :  { %1683 = vmatpush.msra.mxu1 %v1312_v50  ;;  %1770 = vmatpush.msra.mxu2 %v1699_v37 }
 0x487   :  { %1787 = vmatpush.msrb.mxu3 %v1718_v58  ;;  %1803 = vmatpush.msrb.mxu0 %v1738_v54  ;;  %v1744_v58 = vld [vmem:[%s2997_s12 + $0x198] sm:$0xff] }
 0x488   :  { %1684 = vmatpush.msra.mxu1 %v1308_v0 }
 0x489   :  { %1685 = vmatmul.f32.vlgmr.msra.gmra.mxu1 %v2723_v8  ;;  %1788 = vmatpush.msrb.mxu3 %v1717_v2  ;;  %v1698_v8 = vld [vmem:[%s2997_s12 + $0x28] sm:$0xff] }
 0x48a   :  { %1771 = vmatpush.msra.mxu2 %v1698_v8  ;;  %1804 = vmatpush.msrb.mxu0 %v1737_v63  ;;  %v1742_v8 = vld [vmem:[%s2997_s12 + $0x188] sm:$0xff] }
 0x48b   :  { %1789 = vmatpush.msrb.mxu3 %v1716_v14  ;;  %1821 = vmatpush.msrb.mxu1 %v1756_v48  ;;  %v1855_v63 = vld [vmem:[%s2999_s14 + $0x68] sm:$0xff] }
 0x48c   :  { %1772 = vmatpush.msra.mxu2 %v1697_v61  ;;  %1805 = vmatpush.msrb.mxu0 %v1736_v44  ;;  %v1852_v44 = vld [vmem:[%s2999_s14 + $0x50] sm:$0xff] }
 0x48d   :  { %1790 = vmatpush.msrb.mxu3 %v1715_v62  ;;  %1822 = vmatpush.msrb.mxu1 %v1755_v46  ;;  %v1741_v62 = vld [vmem:[%s2997_s12 + $0x180] sm:$0xff] }
 0x48e   :  { %1773 = vmatpush.msra.mxu2 %v1696_v31  ;;  %1806 = vmatpush.msrb.mxu0 %v1735_v13  ;;  %v1849_v13 = vld [vmem:[%s2999_s14 + $0x38] sm:$0xff] }
 0x48f   :  { %1791 = vmatpush.msrb.mxu3 %v1714_v5  ;;  %1823 = vmatpush.msrb.mxu1 %v1754_v17 }
 0x490   :  { %1774 = vmatpush.msra.mxu2 %v1695_v42  ;;  %1807 = vmatpush.msrb.mxu0 %v1734_v26  ;;  %v1857_v42 = vld [vmem:[%s2999_s14 + $0x78] sm:$0xff]  ;;  %v1847_v26 = vld [vmem:[%s2999_s14 + $0x28] sm:$0xff] }
 0x491   :  { %1792 = vmatpush.msrb.mxu3 %v1713_v34  ;;  %1824 = vmatpush.msrb.mxu1 %v1753_v47 }
 0x492   :  { %1775 = vmatpush.msra.mxu2 %v1694_v55  ;;  %1808 = vmatpush.msrb.mxu0 %v1733_v9  ;;  %v1854_v55 = vld [vmem:[%s2999_s14 + $0x60] sm:$0xff] }
 0x493   :  { %1793 = vmatpush.msrb.mxu3 %v1712_v57  ;;  %1825 = vmatpush.msrb.mxu1 %v1752_v40  ;;  %v1856_v57 = vld [vmem:[%s2999_s14 + $0x70] sm:$0xff]  ;;  %v1846_v9 = vld [vmem:[%s2999_s14 + $0x20] sm:$0xff] }
 0x494   :  { %1776 = vmatpush.msra.mxu2 %v1693_v35  ;;  %1809 = vmatpush.msrb.mxu0 %v1732_v24  ;;  %v1851_v35 = vld [vmem:[%s2999_s14 + $0x48] sm:$0xff]  ;;  %v1845_v24 = vld [vmem:[%s2999_s14 + $0x18] sm:$0xff] }
 0x495   :  { %1794 = vmatpush.msrb.mxu3 %v1711_v6  ;;  %1826 = vmatpush.msrb.mxu1 %v1751_v60  ;;  %v1853_v6 = vld [vmem:[%s2999_s14 + $0x58] sm:$0xff] }
 0x496   :  { %1810 = vmatpush.msrb.mxu0 %v1731_v10  ;;  %1862 = vmatpush.msrb.mxu2 %v1857_v42  ;;  %v1843_v10 = vld [vmem:[%s2999_s14 + $0x8] sm:$0xff] }
 0x497   :  { %1795 = vmatpush.msrb.mxu3 %v1710_v7  ;;  %1827 = vmatpush.msrb.mxu1 %v1750_v41  ;;  %v1850_v7 = vld [vmem:[%s2999_s14 + $0x40] sm:$0xff] }
 0x498   :  { %1811 = vmatpush.msrb.mxu0 %v1730_v4  ;;  %1863 = vmatpush.msrb.mxu2 %v1856_v57 }
 0x499   :  { %1796 = vmatpush.msrb.mxu3 %v1709_v51  ;;  %1828 = vmatpush.msrb.mxu1 %v1749_v38  ;;  %v1848_v51 = vld [vmem:[%s2999_s14 + $0x30] sm:$0xff] }
 0x49a   :  { %1812 = vmatpush.msrb.mxu0 %v1729_v33  ;;  %1864 = vmatpush.msrb.mxu2 %v1855_v63 }
 0x49b   :  { %1829 = vmatpush.msrb.mxu1 %v1748_v1 }
 0x49c   :  { %1813 = vmatpush.msrb.mxu0 %v1728_v15  ;;  %1865 = vmatpush.msrb.mxu2 %v1854_v55 }
 0x49d   :  { %1830 = vmatpush.msrb.mxu1 %v1747_v22 }
 0x49e   :  { %1814 = vmatpush.msrb.mxu0 %v1727_v21  ;;  %1866 = vmatpush.msrb.mxu2 %v1853_v6 }
 0x49f   :  { %1831 = vmatpush.msrb.mxu1 %v1746_v28 }
 0x4a0   :  { %1815 = vmatpush.msrb.mxu0 %v1726_v53  ;;  %1867 = vmatpush.msrb.mxu2 %v1852_v44  ;;  %v1996_v53 = vld [vmem:[#allocation10] ss:$0 sm:$0xff] }
 0x4a1   :  { %1832 = vmatpush.msrb.mxu1 %v1745_v29 }
 0x4a2   :  { %1816 = vmatpush.msrb.mxu0 %v1725_v27  ;;  %1868 = vmatpush.msrb.mxu2 %v1851_v35 }
 0x4a3   :  { %1833 = vmatpush.msrb.mxu1 %v1744_v58 }
 0x4a4   :  { %1869 = vmatpush.msrb.mxu2 %v1850_v7 }
 0x4a5   :  { %1834 = vmatpush.msrb.mxu1 %v1743_v45 }
 0x4a6   :  { %1870 = vmatpush.msrb.mxu2 %v1849_v13 }
 0x4a7   :  { %1835 = vmatpush.msrb.mxu1 %v1742_v8 }
 0x4a8   :  { %1871 = vmatpush.msrb.mxu2 %v1848_v51 }
 0x4a9   :  { %1836 = vmatpush.msrb.mxu1 %v1741_v62 }
 0x4aa   :  { %1872 = vmatpush.msrb.mxu2 %v1847_v26 }
 0x4ac   :  { %1873 = vmatpush.msrb.mxu2 %v1846_v9 }
 0x4ae   :  { %1874 = vmatpush.msrb.mxu2 %v1845_v24 }
 0x4b0   :  { %v1386_v11 = vpop.f32.mrf.mxu2 }
 0x4b8   :  { %v1406_v32 = vpop.f32.mrf.mxu3  ;;  %v1466_v49 = vpop.f32.mrf.mxu2 }
 0x4b9   :  { %v1407_v30 = vadd.f32 %v1406_v32, %v1386_v11  ;;  %v1844_v32 = vld [vmem:[%s2999_s14 + $0x10] sm:$0xff]  ;;  %v1842_v11 = vld [vmem:[%s2999_s14] sm:$0xff] }
 0x4ba   :  { %v1426_v39 = vpop.f32.mrf.mxu0  ;;  %1875 = vmatpush.msrb.mxu2 %v1844_v32 }
 0x4bb   :  { %v1427_v16 = vadd.f32 %v1426_v39, %v1407_v30  ;;  %v1995_v30 = vld [vmem:[%s2998_s13] ss:$0 sm:$0xff]  ;;  %s2187_s13 = smov [#allocation11]  }
 0x4bc   :  { %1876 = vmatpush.msrb.mxu2 %v1843_v10  ;;  %s1888_s20 = sshll.u32 %s2187_s13, 4  ;;  %s1889_s20 = int_to_ptr.vmem [resolvable:$true] %s1888_s20 }
 0x4be   :  { %1877 = vmatpush.msrb.mxu2 %v1842_v11 }
 0x4c0   :  { %v1486_v23 = vpop.f32.mrf.mxu3 }
 0x4c1   :  { %v1487_v52 = vadd.f32 %v1486_v23, %v1466_v49 }
 0x4c2   :  { %v1446_v19 = vpop.f32.mrf.mxu1 }
 0x4c3   :  { %v1447_v12 = vadd.f32 %v1446_v19, %v1427_v16 }
 0x4c5   :  { %1689 = vst [vmem:[#allocation12] sm:$0xff] %v1447_v12  ;;  %1777 = vmatmul.f32.vlgmr.msra.gmra.mxu2 %v1447_v12 }
 0x4cd   :  { %v1506_v18 = vpop.f32.mrf.mxu0 }
 0x4ce   :  { %v1507_v43 = vadd.f32 %v1506_v18, %v1487_v52 }
 0x4d0   :  { %v1526_v59 = vpop.f32.mrf.mxu1 }
 0x4d1   :  { %v1527_v20 = vadd.f32 %v1526_v59, %v1507_v43  ;;  %v1546_v25 = vpop.f32.mrf.mxu2 }
 0x4d3   :  { %1690 = vst [vmem:[#allocation12 + $0x8] sm:$0xff] %v1527_v20  ;;  %1797 = vmatmul.f32.vlgmr.msrb.gmra.mxu3 %v1527_v20 }
 0x4da   :  { %v1566_v36 = vpop.f32.mrf.mxu3 }
 0x4db   :  { %v1567_v50 = vadd.f32 %v1566_v36, %v1546_v25 }
 0x4dd   :  { %v1586_v0 = vpop.f32.mrf.mxu0 }
 0x4de   :  { %v1587_v2 = vadd.f32 %v1586_v0, %v1567_v50 }
 0x4e6   :  { %v1606_v37 = vpop.f32.mrf.mxu1 }
 0x4e7   :  { %v1607_v14 = vadd.f32 %v1606_v37, %v1587_v2 }
 0x4e9   :  { %1691 = vst [vmem:[#allocation12 + $0x10] sm:$0xff] %v1607_v14  ;;  %1817 = vmatmul.f32.vlgmr.msrb.gmra.mxu0 %v1607_v14 }
 0x4f4   :  { %v1626_v61 = vpop.f32.mrf.mxu2 }
 0x4fc   :  { %v1646_v56 = vpop.f32.mrf.mxu3 }
 0x4fd   :  { %v1647_v5 = vadd.f32 %v1646_v56, %v1626_v61 }
 0x4fe   :  { %v1666_v3 = vpop.f32.mrf.mxu0 }
 0x4ff   :  { %v1667_v31 = vadd.f32 %v1666_v3, %v1647_v5 }
 0x506   :  { %v1686_v34 = vpop.f32.mrf.mxu1 }
 0x507   :  { %v1687_v54 = vadd.f32 %v1686_v34, %v1667_v31 }
 0x509   :  { %1692 = vst [vmem:[#allocation12 + $0x18] sm:$0xff] %v1687_v54  ;;  %1837 = vmatmul.f32.vlgmr.msrb.gmra.mxu1 %v1687_v54 }
 0x50a   :  { %1904 = dma.vmem_to_hbm [thread:$0]  %s1900_s19, 512, %s1902_s30, [#allocation13]  }
 0x548   :  { %v1778_v39 = vpop.f32.mrf.mxu2 }
 0x549   :  { %v1779_v33 = vadd.f32 %v1995_v30, %v1778_v39 }
 0x556   :  { %v1798_v4 = vpop.f32.mrf.mxu3 }
 0x557   :  { %v1799_v16 = vadd.f32 %v1798_v4, %v1779_v33 }
 0x566   :  { %v1818_v15 = vpop.f32.mrf.mxu0 }
 0x567   :  { %v1819_v19 = vadd.f32 %v1818_v15, %v1799_v16 }
 0x586   :  { %v1838_v21 = vpop.f32.mrf.mxu1 }
 0x587   :  { %v1839_v12 = vadd.f32 %v1838_v21, %v1819_v19 }
 0x589   :  { %v1841_v23 = vmax.f32 %v1839_v12, 0.0 }
 0x58b   :  { %1878 = vmatmul.f32.vlgmr.msrb.gmra.mxu2 %v1841_v23 }
 0x60e   :  { %v1879_v27 = vpop.f32.mrf.mxu2 }
 0x60f   :  { %v1880_v48 = vadd.f32 %v1996_v53, %v1879_v27 }
 0x611   :  { %1882 = vst [vmem:[#allocation11] sm:$0xff] %v1880_v48 }
 0x612   :  { %1893 = dma.vmem_to_hbm [thread:$0]  %s1889_s20, 128, %s1891_s21, [#allocation4]  }
 0x613   :  { %2171 = dma.done.wait [#allocation4], 128  }
 0x614   :  { %2172 = vsyncadd [#allocation4], 4294967168 }
 0x615   :  { %2173 = dma.done.wait [#allocation13], 512  }
 0x616   :  { %2174 = vsyncadd [#allocation13], 4294966784 }
 0x617   :  { %1913 = vsyncpa [#allocation3], 1 }
 0x618   :  { %1914 = vsyncpa [#allocation6], 1 }
 0x619   :  { %1915 = vsyncpa [#allocation9], 1 }
 0x61a   :  { %1916 = vsyncpa [#allocation4], 1 }
 0x61b   :  { %1917 = vsyncpa [#allocation13], 1 }

</bundles_post_ra>
